<compile_context>
chip_gen: v7x
topology: tpu7x:2x2x1
jax: 0.10.0
libtpu: 0.0.40
codegen_flags: <defaults>
</compile_context>

<pallas_src>
import functools

import jax
import jax.numpy as jnp
import numpy as np
from jax import lax
from jax.experimental import pallas as pl
from jax.experimental.pallas import tpu as pltpu


def _bottleneck_kernel(NB, H, W,
                       x_ref, w1_ref, b1_ref, w2_ref, b2_ref, w3_ref, b3_ref,
                       o_ref):
    """One block of NB whole images per grid step.

    x_ref  : (NB*H*W, Cin)    bf16  flattened NHWC input pixels (lane-dense, Cin=128)
    w1_ref : (Cin, width)     bf16  1x1 conv1 weights, BN1 scale folded in
    w2_ref : (9*width, width) bf16  im2col 3x3 conv2 weights, BN2 scale folded in
    w3_ref : (width, Cout)    bf16  1x1 conv3 weights, BN3 scale folded in
    b*_ref : (1, ch)          f32   fused BN bias (beta - mean * scale)
    o_ref  : (NB*H*W, Cout)   f32   output pixels (lane-dense, Cout=128)
    """
    width = w1_ref.shape[1]
    M = NB * H * W

    # ---- conv1 (1x1) + bn1 (scale folded) + relu : one MXU matmul ----
    h1 = jnp.dot(x_ref[...], w1_ref[...], preferred_element_type=jnp.float32)
    h1 = jnp.maximum(h1 + b1_ref[...], 0.0)                    # (M, width) f32

    # ---- conv2 (3x3, pad=1) as ONE im2col matmul; padding/taps stay values ----
    # (no VMEM scratch round trip; per-image halo so images never leak into
    #  each other across the fused batch dimension)
    h1b = h1.astype(jnp.bfloat16).reshape(NB, H, W, width)
    zrow = jnp.zeros((NB, 1, W, width), jnp.bfloat16)
    zcol = jnp.zeros((NB, H + 2, 1, width), jnp.bfloat16)
    h1p = jnp.concatenate([zrow, h1b, zrow], axis=1)            # pad H per image
    h1p = jnp.concatenate([zcol, h1p, zcol], axis=2)            # pad W per image
    taps = [h1p[:, dy:dy + H, dx:dx + W, :]
            for dy in range(3) for dx in range(3)]              # 9 x (NB,H,W,width)
    col = jnp.concatenate(taps, axis=-1).reshape(M, 9 * width)  # (M, 9*width)
    h2 = jnp.dot(col, w2_ref[...], preferred_element_type=jnp.float32)
    h2 = jnp.maximum(h2 + b2_ref[...], 0.0)                     # (M, width) f32

    # ---- conv3 (1x1) + bn3 + residual add + relu (lane-dense store) ----
    h3 = jnp.dot(h2.astype(jnp.bfloat16), w3_ref[...],
                 preferred_element_type=jnp.float32)
    # Late re-read of x for the residual: keeps the conv1 operand out of the
    # live range of the whole body (register pressure at larger tiles).
    res = x_ref[...].astype(jnp.float32)
    o_ref[...] = jnp.maximum(h3 + b3_ref[...] + res, 0.0)


def _prepare_params(w1, w2, w3, bn1, bn2, bn3, eps):
    """Fuse BN into the convs: fold scale into weights (bf16), keep bias in f32."""
    def fuse(bn):
        scale = bn['gamma'] / jnp.sqrt(bn['var'] + eps)
        bias = bn['beta'] - bn['mean'] * scale
        return scale.astype(jnp.float32), bias.astype(jnp.float32)

    s1, b1 = fuse(bn1)
    s2, b2 = fuse(bn2)
    s3, b3 = fuse(bn3)

    width = w1.shape[0]
    cout = w3.shape[0]

    # conv1: OIHW (width, cin, 1, 1) -> (cin, width)
    w1_eff = (jnp.transpose(w1[:, :, 0, 0], (1, 0)) * s1[None, :]).astype(jnp.bfloat16)
    # conv2: OIHW (width, width, 3, 3) -> HWIO (3, 3, width, width) -> (9*width, width)
    w2_hwio = (jnp.transpose(w2, (2, 3, 1, 0)) * s2[None, None, None, :]).astype(jnp.bfloat16)
    w2_col = w2_hwio.reshape(9 * width, width)
    # conv3: OIHW (cout, width, 1, 1) -> (width, cout)
    w3_eff = (jnp.transpose(w3[:, :, 0, 0], (1, 0)) * s3[None, :]).astype(jnp.bfloat16)

    return (w1_eff, b1.reshape(1, width),
            w2_hwio, w2_col, b2.reshape(1, width),
            w3_eff, b3.reshape(1, cout))


def _images_per_block(N, HW, min_m=256, max_m=4096):
    """Images per grid step.

    Per-step M = nb*HW should cover MXU pipeline fill (>= 256 rows), stay within a
    VMEM-friendly cap, and leave >= 2 grid steps (for the two v7x TensorCores)
    when the batch is large enough; tiny problems take everything in one step to
    minimize fixed per-step overhead.
    """
    divisors = [d for d in range(1, N + 1) if N % d == 0]
    fits = [d for d in divisors if d * HW <= max_m]
    if not fits:
        return 1
    good = [d for d in fits if (N // d) >= 2 and d * HW >= min_m]
    if good:
        return min(good)   # most grid parallelism that still fills the MXU
    return max(fits)       # tiny problem: one big step, maximal M


def bottleneck_forward(x_nhwc, w1, w2, w3, bn1, bn2, bn3, eps=1e-5):
    """NHWC in, NHWC out (lane-dense channels; no NCHW<->NHWC HBM round trips).

    x_nhwc: (N, H, W, Cin) float. w1:(width,Cin,1,1) w2:(width,width,3,3)
    w3:(Cout,width,1,1) in PyTorch OIHW. bn*: dicts of gamma/beta/mean/var."""
    N, H, W, Cin = x_nhwc.shape
    width = w1.shape[0]
    Cout = w3.shape[0]
    assert Cin == Cout, "identity residual requires inplanes == planes * expansion"
    # TODO(synk): stride>1 / downsample path not implemented (stride=1, downsample=None here).

    (w1_eff, b1, _w2_hwio, w2_col, b2, w3_eff, b3) = _prepare_params(
        w1, w2, w3, bn1, bn2, bn3, eps)

    HW = H * W
    NB = _images_per_block(N, HW)
    grid = N // NB
    M_blk = NB * HW
    assert M_blk % 8 == 0, "per-step pixel count must be sublane aligned"

    # bf16 activations into the kernel (halves HBM read); residual upcast in-kernel.
    x_flat = x_nhwc.astype(jnp.bfloat16).reshape(N * HW, Cin)

    kernel = functools.partial(_bottleneck_kernel, NB, H, W)

    out_flat = pl.pallas_call(
        kernel,
        out_shape=jax.ShapeDtypeStruct((N * HW, Cout), jnp.float32),
        grid_spec=pltpu.PrefetchScalarGridSpec(
            num_scalar_prefetch=0,
            grid=(grid,),
            in_specs=[
                pl.BlockSpec((M_blk, Cin), lambda n: (n, 0)),
                pl.BlockSpec((Cin, width), lambda n: (0, 0)),
                pl.BlockSpec((1, width), lambda n: (0, 0)),
                pl.BlockSpec((9 * width, width), lambda n: (0, 0)),
                pl.BlockSpec((1, width), lambda n: (0, 0)),
                pl.BlockSpec((width, Cout), lambda n: (0, 0)),
                pl.BlockSpec((1, Cout), lambda n: (0, 0)),
            ],
            out_specs=pl.BlockSpec((M_blk, Cout), lambda n: (n, 0)),
        ),
        compiler_params=pltpu.CompilerParams(
            dimension_semantics=("parallel",)),
    )(x_flat, w1_eff, b1, w2_col, b2, w3_eff, b3)

    return out_flat.reshape(N, H, W, Cout)


def _reference(x_nhwc, w1, w2, w3, bn1, bn2, bn3, eps=1e-5):
    """Pure-JAX reference with the same fused bf16 weights / f32 accumulation /
    bf16 activation input (residual taken from the bf16 x, upcast to f32)."""
    (w1_eff, b1, w2_hwio, _w2_col, b2, w3_eff, b3) = _prepare_params(
        w1, w2, w3, bn1, bn2, bn3, eps)
    xb = x_nhwc.astype(jnp.bfloat16)

    h1 = jnp.einsum('nhwc,cd->nhwd', xb, w1_eff,
                    preferred_element_type=jnp.float32)
    h1 = jnp.maximum(h1 + b1.reshape(1, 1, 1, -1), 0.0)

    dn = lax.conv_dimension_numbers(h1.shape, w2_hwio.shape, ('NHWC', 'HWIO', 'NHWC'))
    h2 = lax.conv_general_dilated(h1.astype(jnp.bfloat16), w2_hwio, (1, 1),
                                  ((1, 1), (1, 1)), dimension_numbers=dn,
                                  preferred_element_type=jnp.float32)
    h2 = jnp.maximum(h2 + b2.reshape(1, 1, 1, -1), 0.0)

    h3 = jnp.einsum('nhwc,cd->nhwd', h2.astype(jnp.bfloat16), w3_eff,
                    preferred_element_type=jnp.float32)
    out = jnp.maximum(h3 + b3.reshape(1, 1, 1, -1) + xb.astype(jnp.float32), 0.0)
    return out


if __name__ == "__main__":
    # Bottleneck with planes=32 -> width=32, inplanes = planes*4 = 128 (= Cout),
    # stride=1, downsample=None. 128 channels -> lane-dense activations.
    N, planes, H, W = 2, 32, 8, 8
    width = planes
    inplanes = planes * 4

    key = jax.random.PRNGKey(0)
    ks = jax.random.split(key, 16)

    x_nchw = jax.random.normal(ks[0], (N, inplanes, H, W), jnp.float32)
    w1 = jax.random.normal(ks[1], (width, inplanes, 1, 1), jnp.float32) * 0.1   # OIHW
    w2 = jax.random.normal(ks[2], (width, width, 3, 3), jnp.float32) * 0.1      # OIHW
    w3 = jax.random.normal(ks[3], (inplanes, width, 1, 1), jnp.float32) * 0.1   # OIHW

    def mk_bn(k1, k2, k3, k4, c):
        return dict(gamma=jax.random.normal(k1, (c,)) * 0.1 + 1.0,
                    beta=jax.random.normal(k2, (c,)) * 0.1,
                    mean=jax.random.normal(k3, (c,)) * 0.1,
                    var=jax.random.uniform(k4, (c,), minval=0.5, maxval=1.5))

    bn1 = mk_bn(ks[4], ks[5], ks[6], ks[7], width)
    bn2 = mk_bn(ks[8], ks[9], ks[10], ks[11], width)
    bn3 = mk_bn(ks[12], ks[13], ks[14], ks[15], inplanes)

    # The kernel works in NHWC (lane-dense channels); convert the NCHW input once.
    x_nhwc = jnp.transpose(x_nchw, (0, 2, 3, 1))

    out = bottleneck_forward(x_nhwc, w1, w2, w3, bn1, bn2, bn3)
    out = jax.block_until_ready(out)

    ref = _reference(x_nhwc, w1, w2, w3, bn1, bn2, bn3)
    np.testing.assert_allclose(np.asarray(out), np.asarray(ref),
                               rtol=2e-2, atol=2e-2)

    print("KERNEL_OK")
</pallas_src>

<mosaic_0001>
module attributes {stable_mosaic.version = 11 : i64} {
  func.func @_bottleneck_kernel(%arg0: i32, %arg1: memref<128x128xbf16, #tpu.memory_space<vmem>>, %arg2: memref<128x32xbf16, #tpu.memory_space<vmem>>, %arg3: memref<1x32xf32, #tpu.memory_space<vmem>>, %arg4: memref<288x32xbf16, #tpu.memory_space<vmem>>, %arg5: memref<1x32xf32, #tpu.memory_space<vmem>>, %arg6: memref<32x128xbf16, #tpu.memory_space<vmem>>, %arg7: memref<1x128xf32, #tpu.memory_space<vmem>>, %arg8: memref<128x128xf32, #tpu.memory_space<vmem>>) attributes {dimension_semantics = [#tpu.dimension_semantics<parallel>], iteration_bounds = array<i64: 1>, scalar_prefetch = 0 : i64, scratch_operands = 0 : i64, tpu.core_type = #tpu.core_type<tc>, window_params = [{transform_indices = @transform_0, window_bounds = array<i64: 128, 128>}, {pipeline_mode = #tpu.pipeline_mode<synchronous>, transform_indices = @transform_1, window_bounds = array<i64: 128, 32>}, {pipeline_mode = #tpu.pipeline_mode<synchronous>, transform_indices = @transform_2, window_bounds = array<i64: 1, 32>}, {pipeline_mode = #tpu.pipeline_mode<synchronous>, transform_indices = @transform_3, window_bounds = array<i64: 288, 32>}, {pipeline_mode = #tpu.pipeline_mode<synchronous>, transform_indices = @transform_4, window_bounds = array<i64: 1, 32>}, {pipeline_mode = #tpu.pipeline_mode<synchronous>, transform_indices = @transform_5, window_bounds = array<i64: 32, 128>}, {pipeline_mode = #tpu.pipeline_mode<synchronous>, transform_indices = @transform_6, window_bounds = array<i64: 1, 128>}, {transform_indices = @transform_7, window_bounds = array<i64: 128, 128>}]} {
    %c0 = arith.constant 0 : index
    %c0_0 = arith.constant 0 : index
    %0 = vector.load %arg1[%c0, %c0_0] : memref<128x128xbf16, #tpu.memory_space<vmem>>, vector<128x128xbf16>
    %c0_1 = arith.constant 0 : index
    %c0_2 = arith.constant 0 : index
    %1 = vector.load %arg2[%c0_1, %c0_2] : memref<128x32xbf16, #tpu.memory_space<vmem>>, vector<128x32xbf16>
    %cst = arith.constant dense<0.000000e+00> : vector<128x32xf32>
    %2 = tpu.matmul %0, %1, %cst {dimension_numbers = #tpu.dot_dimension_numbers<[1], [0], [0], [1], [0, 0, 1, 1], [], []>} : vector<128x128xbf16>, vector<128x32xbf16>, vector<128x32xf32> -> vector<128x32xf32>
    %c0_3 = arith.constant 0 : index
    %c0_4 = arith.constant 0 : index
    %3 = vector.load %arg3[%c0_3, %c0_4] : memref<1x32xf32, #tpu.memory_space<vmem>>, vector<1x32xf32>
    %4 = vector.broadcast %3 : vector<1x32xf32> to vector<128x32xf32>
    %5 = arith.addf %2, %4 : vector<128x32xf32>
    %cst_5 = arith.constant 0.000000e+00 : f32
    %6 = vector.broadcast %cst_5 : f32 to vector<128x32xf32>
    %7 = arith.maximumf %5, %6 : vector<128x32xf32>
    %8 = arith.truncf %7 : vector<128x32xf32> to vector<128x32xbf16>
    %9 = vector.shape_cast %8 : vector<128x32xbf16> to vector<2x8x8x32xbf16>
    %cst_6 = arith.constant 0.000000e+00 : bf16
    %10 = vector.broadcast %cst_6 : bf16 to vector<2x1x8x32xbf16>
    %cst_7 = arith.constant 0.000000e+00 : bf16
    %11 = vector.broadcast %cst_7 : bf16 to vector<2x10x1x32xbf16>
    %12 = tpu.concatenate %10, %9, %10 in 1 : vector<2x1x8x32xbf16>, vector<2x8x8x32xbf16>, vector<2x1x8x32xbf16> -> vector<2x10x8x32xbf16>
    %13 = tpu.concatenate %11, %12, %11 in 2 : vector<2x10x1x32xbf16>, vector<2x10x8x32xbf16>, vector<2x10x1x32xbf16> -> vector<2x10x10x32xbf16>
    %14 = vector.extract_strided_slice %13 {offsets = [0, 0, 0, 0], sizes = [2, 8, 8, 32], strides = [1, 1, 1, 1]} : vector<2x10x10x32xbf16> to vector<2x8x8x32xbf16>
    %15 = vector.extract_strided_slice %13 {offsets = [0, 0, 1, 0], sizes = [2, 8, 8, 32], strides = [1, 1, 1, 1]} : vector<2x10x10x32xbf16> to vector<2x8x8x32xbf16>
    %16 = vector.extract_strided_slice %13 {offsets = [0, 0, 2, 0], sizes = [2, 8, 8, 32], strides = [1, 1, 1, 1]} : vector<2x10x10x32xbf16> to vector<2x8x8x32xbf16>
    %17 = vector.extract_strided_slice %13 {offsets = [0, 1, 0, 0], sizes = [2, 8, 8, 32], strides = [1, 1, 1, 1]} : vector<2x10x10x32xbf16> to vector<2x8x8x32xbf16>
    %18 = vector.extract_strided_slice %13 {offsets = [0, 1, 1, 0], sizes = [2, 8, 8, 32], strides = [1, 1, 1, 1]} : vector<2x10x10x32xbf16> to vector<2x8x8x32xbf16>
    %19 = vector.extract_strided_slice %13 {offsets = [0, 1, 2, 0], sizes = [2, 8, 8, 32], strides = [1, 1, 1, 1]} : vector<2x10x10x32xbf16> to vector<2x8x8x32xbf16>
    %20 = vector.extract_strided_slice %13 {offsets = [0, 2, 0, 0], sizes = [2, 8, 8, 32], strides = [1, 1, 1, 1]} : vector<2x10x10x32xbf16> to vector<2x8x8x32xbf16>
    %21 = vector.extract_strided_slice %13 {offsets = [0, 2, 1, 0], sizes = [2, 8, 8, 32], strides = [1, 1, 1, 1]} : vector<2x10x10x32xbf16> to vector<2x8x8x32xbf16>
    %22 = vector.extract_strided_slice %13 {offsets = [0, 2, 2, 0], sizes = [2, 8, 8, 32], strides = [1, 1, 1, 1]} : vector<2x10x10x32xbf16> to vector<2x8x8x32xbf16>
    %23 = tpu.concatenate %14, %15, %16, %17, %18, %19, %20, %21, %22 in 3 : vector<2x8x8x32xbf16>, vector<2x8x8x32xbf16>, vector<2x8x8x32xbf16>, vector<2x8x8x32xbf16>, vector<2x8x8x32xbf16>, vector<2x8x8x32xbf16>, vector<2x8x8x32xbf16>, vector<2x8x8x32xbf16>, vector<2x8x8x32xbf16> -> vector<2x8x8x288xbf16>
    %24 = vector.shape_cast %23 : vector<2x8x8x288xbf16> to vector<128x288xbf16>
    %c0_8 = arith.constant 0 : index
    %c0_9 = arith.constant 0 : index
    %25 = vector.load %arg4[%c0_8, %c0_9] : memref<288x32xbf16, #tpu.memory_space<vmem>>, vector<288x32xbf16>
    %cst_10 = arith.constant dense<0.000000e+00> : vector<128x32xf32>
    %26 = tpu.matmul %24, %25, %cst_10 {dimension_numbers = #tpu.dot_dimension_numbers<[1], [0], [0], [1], [0, 0, 1, 1], [], []>} : vector<128x288xbf16>, vector<288x32xbf16>, vector<128x32xf32> -> vector<128x32xf32>
    %c0_11 = arith.constant 0 : index
    %c0_12 = arith.constant 0 : index
    %27 = vector.load %arg5[%c0_11, %c0_12] : memref<1x32xf32, #tpu.memory_space<vmem>>, vector<1x32xf32>
    %28 = vector.broadcast %27 : vector<1x32xf32> to vector<128x32xf32>
    %29 = arith.addf %26, %28 : vector<128x32xf32>
    %cst_13 = arith.constant 0.000000e+00 : f32
    %30 = vector.broadcast %cst_13 : f32 to vector<128x32xf32>
    %31 = arith.maximumf %29, %30 : vector<128x32xf32>
    %32 = arith.truncf %31 : vector<128x32xf32> to vector<128x32xbf16>
    %c0_14 = arith.constant 0 : index
    %c0_15 = arith.constant 0 : index
    %33 = vector.load %arg6[%c0_14, %c0_15] : memref<32x128xbf16, #tpu.memory_space<vmem>>, vector<32x128xbf16>
    %cst_16 = arith.constant dense<0.000000e+00> : vector<128x128xf32>
    %34 = tpu.matmul %32, %33, %cst_16 {dimension_numbers = #tpu.dot_dimension_numbers<[1], [0], [0], [1], [0, 0, 1, 1], [], []>} : vector<128x32xbf16>, vector<32x128xbf16>, vector<128x128xf32> -> vector<128x128xf32>
    %c0_17 = arith.constant 0 : index
    %c0_18 = arith.constant 0 : index
    %35 = vector.load %arg1[%c0_17, %c0_18] : memref<128x128xbf16, #tpu.memory_space<vmem>>, vector<128x128xbf16>
    %36 = arith.extf %35 : vector<128x128xbf16> to vector<128x128xf32>
    %c0_19 = arith.constant 0 : index
    %c0_20 = arith.constant 0 : index
    %37 = vector.load %arg7[%c0_19, %c0_20] : memref<1x128xf32, #tpu.memory_space<vmem>>, vector<1x128xf32>
    %38 = vector.broadcast %37 : vector<1x128xf32> to vector<128x128xf32>
    %39 = arith.addf %34, %38 : vector<128x128xf32>
    %40 = arith.addf %39, %36 : vector<128x128xf32>
    %cst_21 = arith.constant 0.000000e+00 : f32
    %41 = vector.broadcast %cst_21 : f32 to vector<128x128xf32>
    %42 = arith.maximumf %40, %41 : vector<128x128xf32>
    %c0_22 = arith.constant 0 : index
    %c0_23 = arith.constant 0 : index
    %43 = vector.load %arg8[%c0_22, %c0_23] : memref<128x128xf32, #tpu.memory_space<vmem>>, vector<128x128xf32>
    tpu.vector_store %arg8[%c0_22, %c0_23], %42 {strides = array<i32>} : memref<128x128xf32, #tpu.memory_space<vmem>>, vector<128x128xf32>,
    return
  }
  func.func @transform_0(%arg0: i32) -> (i32, i32) {
    %c0_i32 = arith.constant 0 : i32
    %c0_i32_0 = arith.constant 0 : i32
    return %arg0, %c0_i32 : i32, i32
  }
  func.func @transform_1(%arg0: i32) -> (i32, i32) {
    %c0_i32 = arith.constant 0 : i32
    %c0_i32_0 = arith.constant 0 : i32
    %c0_i32_1 = arith.constant 0 : i32
    return %c0_i32, %c0_i32_0 : i32, i32
  }
  func.func @transform_2(%arg0: i32) -> (i32, i32) {
    %c0_i32 = arith.constant 0 : i32
    %c0_i32_0 = arith.constant 0 : i32
    %c0_i32_1 = arith.constant 0 : i32
    return %c0_i32, %c0_i32_0 : i32, i32
  }
  func.func @transform_3(%arg0: i32) -> (i32, i32) {
    %c0_i32 = arith.constant 0 : i32
    %c0_i32_0 = arith.constant 0 : i32
    %c0_i32_1 = arith.constant 0 : i32
    return %c0_i32, %c0_i32_0 : i32, i32
  }
  func.func @transform_4(%arg0: i32) -> (i32, i32) {
    %c0_i32 = arith.constant 0 : i32
    %c0_i32_0 = arith.constant 0 : i32
    %c0_i32_1 = arith.constant 0 : i32
    return %c0_i32, %c0_i32_0 : i32, i32
  }
  func.func @transform_5(%arg0: i32) -> (i32, i32) {
    %c0_i32 = arith.constant 0 : i32
    %c0_i32_0 = arith.constant 0 : i32
    %c0_i32_1 = arith.constant 0 : i32
    return %c0_i32, %c0_i32_0 : i32, i32
  }
  func.func @transform_6(%arg0: i32) -> (i32, i32) {
    %c0_i32 = arith.constant 0 : i32
    %c0_i32_0 = arith.constant 0 : i32
    %c0_i32_1 = arith.constant 0 : i32
    return %c0_i32, %c0_i32_0 : i32, i32
  }
  func.func @transform_7(%arg0: i32) -> (i32, i32) {
    %c0_i32 = arith.constant 0 : i32
    %c0_i32_0 = arith.constant 0 : i32
    return %arg0, %c0_i32 : i32, i32
  }
}

</mosaic_0001>

<bundles_post_ra>
// kernel: tpu_custom_call.1
= control target key start
LH: loop header
LB: loop body
LE: loop exit
PB: predicated region body
PF: predicated region fallthrough
CT: control target
= control target key end

     0   :  { %s3090_s0 = inlined_call_operand.vmem [shape: bf16[128,128], index: 0, kind: input, shape index: {}]   ;;  %s3091_s1 = inlined_call_operand.vmem [shape: bf16[128,32], index: 1, kind: input, shape index: {}]   ;;  %s3092_s2 = inlined_call_operand.vmem [shape: f32[1,32], index: 2, kind: input, shape index: {}]   ;;  %s3093_s3 = inlined_call_operand.vmem [shape: bf16[288,32], index: 3, kind: input, shape index: {}]   ;;  %s3094_s4 = inlined_call_operand.vmem [shape: f32[1,32], index: 4, kind: input, shape index: {}]   ;;  %s3095_s5 = inlined_call_operand.vmem [shape: bf16[32,128], index: 5, kind: input, shape index: {}]   ;;  %s3096_s6 = inlined_call_operand.vmem [shape: f32[1,128], index: 6, kind: input, shape index: {}]   ;;  %s3097_s7 = inlined_call_operand.hbm [shape: f32[128,128], index: 7, kind: output, shape index: {}]  }
   0x1   :  { %v2077_v0 = vld [vmem:[%s3091_s1] sm:$0xff]   ;;  %v2078_v1 = vld [vmem:[%s3091_s1 + $0x8] sm:$0xff]   ;;  %v2079_v2 = vld [vmem:[%s3091_s1 + $0x10] sm:$0xff]  }
   0x2   :  { %1989 = vmatprep.subr.bf16.mxu0 %v2077_v0  ;;  %v2080_v3 = vld [vmem:[%s3091_s1 + $0x18] sm:$0xff]   ;;  %v28_v4 = vld [vmem:[%s3090_s0] sm:$0xff]   ;;  %v2082_v6 = vld [vmem:[%s3091_s1 + $0x28] sm:$0xff]  }
   0x3   :  { %1990 = vmatpush3.bf16.msra.mxu0 %v2077_v0  ;;  %v2081_v5 = vld [vmem:[%s3091_s1 + $0x20] sm:$0xff]   ;;  %2005 = vmatprep.mubr.bf16.mxu0 %v28_v4  ;;  %v2083_v7 = vld [vmem:[%s3091_s1 + $0x30] sm:$0xff]   ;;  %v2084_v8 = vld [vmem:[%s3091_s1 + $0x38] sm:$0xff]  }
   0x4   :  { %1991 = vmatprep.subr.bf16.mxu0 %v2078_v1 }
   0x7   :  { %1992 = vmatpush3.bf16.msra.mxu0 %v2078_v1 }
   0x8   :  { %1993 = vmatprep.subr.bf16.mxu0 %v2079_v2 }
   0xb   :  { %1994 = vmatpush3.bf16.msra.mxu0 %v2079_v2 }
   0xc   :  { %1995 = vmatprep.subr.bf16.mxu0 %v2080_v3 }
   0xf   :  { %1996 = vmatpush3.bf16.msra.mxu0 %v2080_v3 }
  0x10   :  { %1997 = vmatprep.subr.bf16.mxu0 %v2081_v5 }
  0x13   :  { %1998 = vmatpush3.bf16.msra.mxu0 %v2081_v5 }
  0x14   :  { %1999 = vmatprep.subr.bf16.mxu0 %v2082_v6 }
  0x17   :  { %2000 = vmatpush3.bf16.msra.mxu0 %v2082_v6 }
  0x18   :  { %2001 = vmatprep.subr.bf16.mxu0 %v2083_v7 }
  0x19   :  { %12 = vsyncpa [#allocation3], 0  ;;  %v30_v9 = vld [vmem:[%s3090_s0 + $0x8] sm:$0xff]   ;;  %v32_v10 = vld [vmem:[%s3090_s0 + $0x10] sm:$0xff]   ;;  %vm460_vm0 = vcmask 1040384   ;;  %v2153_v16 = vmov 0  }
  0x1a   :  { %v34_v11 = vld [vmem:[%s3090_s0 + $0x18] sm:$0xff]   ;;  %v36_v12 = vld [vmem:[%s3090_s0 + $0x20] sm:$0xff]   ;;  %v38_v13 = vld [vmem:[%s3090_s0 + $0x28] sm:$0xff]   ;;  %vm461_vm1 = vsmask.f32 256  ;;  %v327_v17 = vrot.slane %v2153_v16, 7 }
  0x1b   :  { %2002 = vmatpush3.bf16.msra.mxu0 %v2083_v7  ;;  %v40_v14 = vld [vmem:[%s3090_s0 + $0x30] sm:$0xff]   ;;  %v42_v15 = vld [vmem:[%s3090_s0 + $0x38] sm:$0xff]   ;;  %vm2248_vm2 = vmand %vm460_vm0, %vm461_vm1  ;;  %vm480_vm3 = vcmask 1044480   ;;  %vm481_vm4 = vsmask.f32 4352  ;;  %s2154_s9 = smov 64  }
  0x1c   :  { %2003 = vmatprep.subr.bf16.mxu0 %v2084_v8  ;;  %vm2252_vm5 = vmand %vm480_vm3, %vm481_vm4  ;;  %v463_v20 = vsel %vm2248_vm2, 0, %v327_v17  ;;  %s2155_s10 = smov 32   ;;  %s2156_s11 = smov 96   ;;  %v2275_v28 = vld [vmem:[%s3093_s3 + $0x80] sm:$0xff]   ;;  %v2282_v29 = vld [vmem:[%s3093_s3 + $0x88] sm:$0xff]   ;;  %vm837_vm6 = vcmask 261120  }
  0x1d   :  { %v2260_v21 = vsel %vm2252_vm5, %v463_v20, 0  ;;  %v2289_v30 = vld [vmem:[%s3092_s2] ss:$0 sm:$0xff]  ;;  %vm868_vm7 = vcmask 523264   ;;  %vm899_vm8 = vcmask 785408  }
  0x1e   :  { %v503_v22 = vshll.u32 %v2260_v21, 16  ;;  %v2264_v23 = vrot.slane %v2260_v21, 1  ;;  %v501_v24 = vshrl.u32 %v2260_v21, 16 }
  0x1f   :  { %2004 = vmatpush3.bf16.msra.mxu0 %v2084_v8 }
  0x20   :  { %3109 = vst [vmem:[#allocation5_spill] sm:$0xff] %v2264_v23  ;;  %v505_v25 = vrot.slane %v503_v22, 1  ;;  %v2072_v26 = vpack.i.bf16 %v2260_v21, %v2264_v23  ;;  %2021 = vmatprep.subr.bf16.mxu0 %v2275_v28 }
  0x22   :  { %2006 = vmatmul.mubr.bf16.vlgmr.msra.gmra.mrb[0].mxu0 %v30_v9  ;;  %v506_v27 = vor.u32 %v505_v25, %v501_v24  ;;  %2073 = vrot.lane.b32.xlu0 %v2072_v26, %s2154_s9 }
  0x23   :  { %2009 = vmatprep.mubr.bf16.mxu0 %v32_v10  ;;  %2022 = vmatpush3.bf16.msra.mxu0 %v2275_v28 }
  0x24   :  { %605 = vrot.lane.b32.xlu1 %v506_v27, %s2155_s10  ;;  %2023 = vmatprep.subr.bf16.mxu0 %v2282_v29 }
  0x26   :  { %821 = vrot.lane.b32.xlu0 %v506_v27, %s2156_s11 }
  0x27   :  { %2024 = vmatpush3.bf16.msra.mxu0 %v2282_v29 }
  0x2a   :  { %2010 = vmatmul.mubr.bf16.gmra.mrb[4].mxu0 %v34_v11 }
  0x2b   :  { %2013 = vmatprep.mubr.bf16.mxu0 %v36_v12 }
  0x32   :  { %2014 = vmatmul.mubr.bf16.gmra.mrb[8].mxu0 %v38_v13 }
  0x33   :  { %2017 = vmatprep.mubr.bf16.mxu0 %v40_v14 }
  0x3a   :  { %2018 = vmatmul.mubr.bf16.gmra.mrb[12].mxu0 %v42_v15 }
  0xf5   :  { %v2007_v31 = vpop.f32.mrb[0].mxu0 }
  0xf6   :  { %v206_v32 = vadd.f32 %v2007_v31, %v2289_v30  ;;  %v197_v33 = vpop.f32.mrb[1].mxu0 }
  0xf7   :  { %v198_v34 = vadd.f32 %v2289_v30, %v197_v33  ;;  %v2008_v35 = vpop.f32.mrb[2].mxu0 }
  0xf8   :  { %v262_v36 = vmax.f32 %v206_v32, 0.0  ;;  %v209_v37 = vadd.f32 %v2008_v35, %v2289_v30  ;;  %v200_v38 = vpop.f32.mrb[3].mxu0 }
  0xf9   :  { %v260_v39 = vmax.f32 %v198_v34, 0.0  ;;  %v201_v40 = vadd.f32 %v2289_v30, %v200_v38  ;;  %v2095_v38 = vld [vmem:[%s3093_s3 + $0x40] sm:$0xff]  }
  0xfa   :  { %v1875_v41 = vpack.c.bf16 %v262_v36, %v262_v36  ;;  %v263_v42 = vmax.f32 %v209_v37, 0.0  ;;  %1905 = vmatprep.subr.bf16.mxu1 %v2095_v38  ;;  %v2104_v38 = vld [vmem:[%s3093_s3 + $0x20] sm:$0xff]  }
  0xfb   :  { %v1873_v43 = vpack.c.bf16 %v260_v39, %v260_v39  ;;  %v261_v44 = vmax.f32 %v201_v40, 0.0  ;;  %v2096_v39 = vld [vmem:[%s3093_s3] sm:$0xff]  }
  0xfc   :  { %v346_v45 = vshrl.u32 %v1875_v41, 16  ;;  %v1876_v46 = vpack.c.bf16 %v263_v42, %v263_v42  ;;  %v349_v47 = vshll.u32 %v1875_v41, 16  ;;  %1906 = vmatpush3.bf16.msra.mxu1 %v2096_v39 }
  0xfd   :  { %v332_v48 = vshrl.u32 %v1873_v43, 16  ;;  %v1874_v49 = vpack.c.bf16 %v261_v44, %v261_v44  ;;  %v2011_v50 = vpop.f32.mrb[4].mxu0  ;;  %v335_v52 = vshll.u32 %v1873_v43, 16 }
  0xfe   :  { %v348_v51 = vrot.slane %v346_v45, 7  ;;  %v353_v53 = vshrl.u32 %v1876_v46, 16  ;;  %v222_v54 = vadd.f32 %v2011_v50, %v2289_v30  ;;  %v213_v55 = vpop.f32.mrb[5].mxu0  ;;  %v356_v57 = vshll.u32 %v1876_v46, 16 }
  0xff   :  { %v334_v56 = vrot.slane %v332_v48, 7  ;;  %v339_v58 = vshrl.u32 %v1874_v49, 16  ;;  %v214_v59 = vadd.f32 %v2289_v30, %v213_v55  ;;  %v2012_v60 = vpop.f32.mrb[6].mxu0  ;;  %v342_v4 = vshll.u32 %v1874_v49, 16 }
 0x100   :  { %v351_v61 = vor.u32 %v349_v47, %v348_v51  ;;  %v355_v62 = vrot.slane %v353_v53, 7  ;;  %v266_v63 = vmax.f32 %v222_v54, 0.0  ;;  %v225_v0 = vadd.f32 %v2012_v60, %v2289_v30  ;;  %v216_v1 = vpop.f32.mrb[7].mxu0  ;;  %v2097_v51 = vld [vmem:[%s3093_s3 + $0x48] sm:$0xff]  }
 0x101   :  { %v337_v2 = vor.u32 %v335_v52, %v334_v56  ;;  %v341_v3 = vrot.slane %v339_v58, 7  ;;  %v264_v5 = vmax.f32 %v214_v59, 0.0  ;;  %v217_v16 = vadd.f32 %v2289_v30, %v216_v1  ;;  %v2098_v52 = vld [vmem:[%s3093_s3 + $0x8] sm:$0xff]   ;;  %1907 = vmatprep.subr.bf16.mxu1 %v2097_v51 }
 0x102   :  { %v466_v6 = vsel %vm2248_vm2, 0, %v351_v61  ;;  %v358_v7 = vor.u32 %v356_v57, %v355_v62  ;;  %v1879_v8 = vpack.c.bf16 %v266_v63, %v266_v63  ;;  %v267_v12 = vmax.f32 %v225_v0, 0.0  ;;  %1908 = vmatpush3.bf16.msra.mxu1 %v2098_v52  ;;  %v2099_v0 = vld [vmem:[%s3093_s3 + $0x50] sm:$0xff]  }
 0x103   :  { %v344_v9 = vor.u32 %v342_v4, %v341_v3  ;;  %v1877_v10 = vpack.c.bf16 %v264_v5, %v264_v5  ;;  %v2302_v11 = vsel %vm2252_vm5, %v466_v6, 0  ;;  %v464_v15 = vsel %vm2248_vm2, 0, %v337_v2  ;;  %v2100_v5 = vld [vmem:[%s3093_s3 + $0x10] sm:$0xff]   ;;  %1909 = vmatprep.subr.bf16.mxu1 %v2099_v0 }
 0x104   :  { %v374_v13 = vshrl.u32 %v1879_v8, 16  ;;  %v377_v14 = vshll.u32 %v1879_v8, 16  ;;  %701 = vrot.lane.b32.xlu0 %v2302_v11, %s2156_s11  ;;  %779 = vrot.lane.b32.xlu1 %v2302_v11, %s2154_s9  ;;  %v467_v25 = vsel %vm2248_vm2, 0, %v358_v7  ;;  %v653_v31 = vrot.slane %v2302_v11, 1 }
 0x105   :  { %v465_v17 = vsel %vm2248_vm2, 0, %v344_v9  ;;  %v360_v20 = vshrl.u32 %v1877_v10, 16  ;;  %v363_v22 = vshll.u32 %v1877_v10, 16  ;;  %v2015_v24 = vpop.f32.mrb[8].mxu0  ;;  %v2322_v34 = vsel %vm2252_vm5, %v464_v15, 0 }
 0x106   :  { %v2317_v26 = vsel %vm2252_vm5, %v465_v17, 0  ;;  %v376_v27 = vrot.slane %v374_v13, 7  ;;  %v229_v32 = vpop.f32.mrb[9].mxu0  ;;  %v1880_v36 = vpack.c.bf16 %v267_v12, %v267_v12  ;;  %v265_v41 = vmax.f32 %v217_v16, 0.0  ;;  %1910 = vmatpush3.bf16.msra.mxu1 %v2100_v5 }
 0x107   :  { %v362_v33 = vrot.slane %v360_v20, 7  ;;  %v2325_v35 = vrot.slane %v2317_v26, 1  ;;  %v2016_v37 = vpop.f32.mrb[10].mxu0  ;;  %v2339_v47 = vsel %vm2252_vm5, %v467_v25, 0  ;;  %v651_v61 = vrot.slane %v2322_v34, 1  ;;  %v2102_v25 = vld [vmem:[%s3093_s3 + $0x18] sm:$0xff]  }
 0x108   :  { %v379_v40 = vor.u32 %v377_v14, %v376_v27  ;;  %671 = vrot.lane.b32.xlu1 %v653_v31, %s2154_s9  ;;  %697 = vrot.lane.b32.xlu0 %v2322_v34, %s2156_s11  ;;  %v232_v42 = vpop.f32.mrb[11].mxu0  ;;  %v381_v45 = vshrl.u32 %v1880_v36, 16  ;;  %v384_v46 = vshll.u32 %v1880_v36, 16  ;;  %v1878_v48 = vpack.c.bf16 %v265_v41, %v265_v41 }
 0x109   :  { %v365_v43 = vor.u32 %v363_v22, %v362_v33  ;;  %v1814_v44 = vcombine.low %v2325_v35, %v653_v31  ;;  %v654_v58 = vrot.slane %v2339_v47, 1  ;;  %v2385_v8 = vadd.f32 %v2015_v24, %v2289_v30  ;;  %v2101_v24 = vld [vmem:[%s3093_s3 + $0x58] sm:$0xff]  }
 0x10a   :  { %v383_v50 = vrot.slane %v381_v45, 7  ;;  %v470_v53 = vsel %vm2248_vm2, 0, %v379_v40  ;;  %v367_v55 = vshrl.u32 %v1878_v48, 16  ;;  %v370_v56 = vshll.u32 %v1878_v48, 16  ;;  %1911 = vmatprep.subr.bf16.mxu1 %v2101_v24  ;;  %v2108_v48 = vld [vmem:[%s3093_s3 + $0x30] sm:$0xff]  }
 0x10b   :  { %v468_v49 = vsel %vm2248_vm2, 0, %v365_v43  ;;  %2025 = vmatprep.mubr.msk.bf16.mxu0 %vm837_vm6, %v1814_v44  ;;  %v2369_v1 = vsel %vm2252_vm5, %v470_v53, 0  ;;  %v524_v10 = vshll.u32 %v2302_v11, 16  ;;  %v2390_v12 = vadd.f32 %v2289_v30, %v229_v32  ;;  %1912 = vmatpush3.bf16.msra.mxu1 %v2102_v25  ;;  %v2106_v43 = vld [vmem:[%s3093_s3 + $0x28] sm:$0xff]  }
 0x10c   :  { %v2354_v54 = vsel %vm2252_vm5, %v468_v49, 0  ;;  %703 = vrot.lane.b32.xlu1 %v2339_v47, %s2156_s11  ;;  %749 = vrot.lane.b32.xlu0 %v653_v31, %s2155_s10  ;;  %v386_v59 = vor.u32 %v384_v46, %v383_v50  ;;  %v369_v62 = vrot.slane %v367_v55, 7  ;;  %v2393_v13 = vadd.f32 %v2016_v37, %v2289_v30  ;;  %v2103_v37 = vld [vmem:[%s3093_s3 + $0x60] sm:$0xff]   ;;  %v2107_v46 = vld [vmem:[%s3093_s3 + $0x70] sm:$0xff]  }
 0x10d   :  { %v2360_v57 = vrot.slane %v2354_v54, 1  ;;  %v2019_v60 = vpop.f32.mrb[12].mxu0  ;;  %v2398_v15 = vrot.slane %v2369_v1, 1  ;;  %v2402_v17 = vadd.f32 %v2289_v30, %v232_v42  ;;  %v526_v31 = vrot.slane %v524_v10, 1  ;;  %1913 = vmatprep.subr.bf16.mxu1 %v2103_v37  ;;  %v2105_v42 = vld [vmem:[%s3093_s3 + $0x68] sm:$0xff]   ;;  %v2109_v55 = vld [vmem:[%s3093_s3 + $0x78] sm:$0xff]  }
 0x10e   :  { %v245_v63 = vpop.f32.mrb[13].mxu0  ;;  %v471_v3 = vsel %vm2248_vm2, 0, %v386_v59  ;;  %v372_v7 = vor.u32 %v370_v56, %v369_v62  ;;  %v2421_v27 = vadd.f32 %v2019_v60, %v2289_v30  ;;  %v522_v36 = vshrl.u32 %v2302_v11, 16  ;;  %v2110_v56 = vld [vmem:[%s3093_s3 + $0x38] sm:$0xff]  }
 0x10f   :  { %v1817_v2 = vcombine.low %v654_v58, %v2360_v57  ;;  %v2020_v4 = vpop.f32.mrb[14].mxu0  ;;  %v2382_v6 = vsel %vm2252_vm5, %v471_v3, 0  ;;  %v510_v40 = vshll.u32 %v2322_v34, 16  ;;  %v2444_v41 = vadd.f32 %v2289_v30, %v245_v63  ;;  %1914 = vmatpush3.bf16.msra.mxu1 %v2104_v38 }
 0x110   :  { %781 = vrot.lane.b32.xlu0 %v2339_v47, %s2154_s9  ;;  %667 = vrot.lane.b32.xlu1 %v651_v61, %s2154_s9  ;;  %v248_v9 = vpop.f32.mrb[15].mxu0  ;;  %v469_v14 = vsel %vm2248_vm2, 0, %v372_v7  ;;  %v743_v16 = vrot.slane %v2382_v6, 1  ;;  %v2439_v39 = vor.u32 %v526_v31, %v522_v36  ;;  %v531_v45 = vshll.u32 %v2339_v47, 16 }
 0x111   :  { %2026 = vmatmul.mubr.msk.bf16.vlgmr.msra.gmra.mrb[16].mxu0 %vm837_vm6, %v1817_v2  ;;  %v2406_v20 = vsel %vm2252_vm5, %v469_v14, 0  ;;  %1915 = vmatprep.subr.bf16.mxu1 %v2105_v42  ;;  %v512_v44 = vrot.slane %v510_v40, 1  ;;  %v508_v49 = vshrl.u32 %v2322_v34, 16  ;;  %v2470_v52 = vadd.f32 %v2020_v4, %v2289_v30 }
 0x112   :  { %v2412_v22 = vrot.slane %v2406_v20, 1  ;;  %v1823_v33 = vcombine.low %v743_v16, %v2264_v23  ;;  %v533_v51 = vrot.slane %v531_v45, 1  ;;  %v2473_v53 = vadd.f32 %v2289_v30, %v248_v9 }
 0x113   :  { %1916 = vmatpush3.bf16.msra.mxu1 %v2106_v43  ;;  %v2467_v50 = vor.u32 %v512_v44, %v508_v49  ;;  %v517_v59 = vshll.u32 %v2317_v26, 16  ;;  %v515_v60 = vshrl.u32 %v2317_v26, 16  ;;  %v552_v62 = vshll.u32 %v2369_v1, 16 }
 0x114   :  { %699 = vrot.lane.b32.xlu1 %v2317_v26, %s2156_s11  ;;  %745 = vrot.lane.b32.xlu0 %v651_v61, %s2155_s10  ;;  %v1820_v32 = vcombine.low %v2412_v22, %v2398_v15  ;;  %v270_v63 = vmax.f32 %v2385_v8, 0.0  ;;  %v550_v0 = vshrl.u32 %v2369_v1, 16  ;;  %v538_v5 = vshll.u32 %v2354_v54, 16 }
 0x115   :  { %1917 = vmatprep.subr.bf16.mxu1 %v2107_v46  ;;  %v554_v2 = vrot.slane %v552_v62, 1  ;;  %v271_v7 = vmax.f32 %v2393_v13, 0.0  ;;  %v536_v9 = vshrl.u32 %v2354_v54, 16  ;;  %v545_v14 = vshll.u32 %v2406_v20, 16 }
 0x116   :  { %2029 = vmatprep.mubr.msk.bf16.mxu0 %vm837_vm6, %v1820_v32  ;;  %v1883_v3 = vpack.c.bf16 %v270_v63, %v270_v63  ;;  %v540_v10 = vrot.slane %v538_v5, 1  ;;  %v543_v31 = vshrl.u32 %v2406_v20, 16  ;;  %v730_v38 = vshrl.u32 %v2382_v6, 16 }
 0x117   :  { %1918 = vmatpush3.bf16.msra.mxu1 %v2108_v48  ;;  %v2529_v4 = vor.u32 %v554_v2, %v550_v0  ;;  %v547_v32 = vrot.slane %v545_v14, 1  ;;  %v272_v14 = vmax.f32 %v2444_v41, 0.0  ;;  %v2626_v41 = vpop.permute.xlu1 %605 }
 0x118   :  { %751 = vrot.lane.b32.xlu1 %v654_v58, %s2155_s10  ;;  %777 = vrot.lane.b32.xlu0 %v2317_v26, %s2154_s9  ;;  %v402_v8 = vshrl.u32 %v1883_v3, 16  ;;  %v405_v24 = vshll.u32 %v1883_v3, 16  ;;  %v2545_v25 = vor.u32 %v540_v10, %v536_v9  ;;  %v2610_v9 = vpop.permute.xlu0 %2073 }
 0x119   :  { %2030 = vmatmul.mubr.msk.bf16.gmra.mrb[20].mxu0 %vm837_vm6, %v1823_v33  ;;  %1919 = vmatprep.subr.bf16.mxu1 %v2109_v55  ;;  %v732_v33 = vshll.u32 %v2382_v6, 16 }
 0x11a   :  { %v404_v13 = vrot.slane %v402_v8, 7  ;;  %v274_v8 = vmax.f32 %v2421_v27, 0.0 }
 0x11b   :  { %1920 = vmatpush3.bf16.msra.mxu1 %v2110_v56  ;;  %v734_v40 = vrot.slane %v732_v33, 1 }
 0x11c   :  { %809 = vrot.lane.b32.xlu1 %v2439_v39, %s2156_s11  ;;  %673 = vrot.lane.b32.xlu0 %v654_v58, %s2154_s9  ;;  %v529_v58 = vshrl.u32 %v2339_v47, 16  ;;  %v1887_v10 = vpack.c.bf16 %v274_v8, %v274_v8 }
 0x11d   :  { %2061 = vmatprep.subr.bf16.mxu1 %v2275_v28  ;;  %v2562_v48 = vor.u32 %v734_v40, %v730_v38  ;;  %v275_v38 = vmax.f32 %v2470_v52, 0.0 }
 0x11e   :  { %v2486_v30 = vor.u32 %v533_v51, %v529_v58 }
 0x11f   :  { %v1888_v52 = vpack.c.bf16 %v275_v38, %v275_v38 }
 0x120   :  { %611 = vrot.lane.b32.xlu1 %v2439_v39, %s2155_s10  ;;  %747 = vrot.lane.b32.xlu0 %v2325_v35, %s2155_s10 }
 0x121   :  { %v437_v8 = vshrl.u32 %v1888_v52, 16 }
 0x124   :  { %669 = vrot.lane.b32.xlu0 %v2325_v35, %s2154_s9  ;;  %607 = vrot.lane.b32.xlu1 %v2467_v50, %s2155_s10  ;;  %v519_v35 = vrot.slane %v517_v59, 1 }
 0x126   :  { %v2499_v61 = vor.u32 %v519_v35, %v515_v60 }
 0x128   :  { %811 = vrot.lane.b32.xlu0 %v2486_v30, %s2156_s11  ;;  %787 = vrot.lane.b32.xlu1 %v2369_v1, %s2154_s9 }
 0x12c   :  { %613 = vrot.lane.b32.xlu0 %v2486_v30, %s2155_s10  ;;  %709 = vrot.lane.b32.xlu1 %v2369_v1, %s2156_s11 }
 0x130   :  { %807 = vrot.lane.b32.xlu0 %v2499_v61, %s2156_s11  ;;  %783 = vrot.lane.b32.xlu1 %v2354_v54, %s2154_s9 }
 0x134   :  { %609 = vrot.lane.b32.xlu0 %v2499_v61, %s2155_s10  ;;  %675 = vrot.lane.b32.xlu1 %v2360_v57, %s2154_s9 }
 0x138   :  { %705 = vrot.lane.b32.xlu0 %v2354_v54, %s2156_s11  ;;  %707 = vrot.lane.b32.xlu1 %v2406_v20, %s2156_s11 }
 0x13c   :  { %757 = vrot.lane.b32.xlu0 %v2398_v15, %s2155_s10  ;;  %759 = vrot.lane.b32.xlu1 %v743_v16, %s2155_s10  ;;  %v1884_v16 = vpack.c.bf16 %v271_v7, %v271_v7 }
 0x13e   :  { %v412_v44 = vshll.u32 %v1884_v16, 16 }
 0x140   :  { %789 = vrot.lane.b32.xlu0 %v2382_v6, %s2154_s9  ;;  %755 = vrot.lane.b32.xlu1 %v2412_v22, %s2155_s10 }
 0x144   :  { %679 = vrot.lane.b32.xlu0 %v2398_v15, %s2154_s9  ;;  %677 = vrot.lane.b32.xlu1 %v2412_v22, %s2154_s9  ;;  %v268_v15 = vmax.f32 %v2390_v12, 0.0  ;;  %v269_v22 = vmax.f32 %v2402_v17, 0.0  ;;  %v409_v12 = vshrl.u32 %v1884_v16, 16  ;;  %v2553_v17 = vor.u32 %v547_v32, %v543_v31 }
 0x145   :  { %v430_v16 = vshrl.u32 %v1887_v10, 16 }
 0x146   :  { %v1881_v36 = vpack.c.bf16 %v268_v15, %v268_v15  ;;  %v1882_v37 = vpack.c.bf16 %v269_v22, %v269_v22  ;;  %v411_v43 = vrot.slane %v409_v12, 7  ;;  %v1885_v22 = vpack.c.bf16 %v272_v14, %v272_v14 }
 0x147   :  { %v433_v12 = vshll.u32 %v1887_v10, 16 }
 0x148   :  { %711 = vrot.lane.b32.xlu0 %v2382_v6, %s2156_s11  ;;  %817 = vrot.lane.b32.xlu1 %v2529_v4, %s2156_s11  ;;  %v388_v42 = vshrl.u32 %v1881_v36, 16  ;;  %v395_v45 = vshrl.u32 %v1882_v37, 16  ;;  %v391_v49 = vshll.u32 %v1881_v36, 16  ;;  %v414_v55 = vor.u32 %v412_v44, %v411_v43 }
 0x149   :  { %v398_v56 = vshll.u32 %v1882_v37, 16  ;;  %v432_v36 = vrot.slane %v430_v16, 7  ;;  %v416_v37 = vshrl.u32 %v1885_v22, 16 }
 0x14a   :  { %v390_v51 = vrot.slane %v388_v42, 7  ;;  %v397_v6 = vrot.slane %v395_v45, 7  ;;  %v475_v60 = vsel %vm2248_vm2, 0, %v414_v55 }
 0x14b   :  { %v2583_v63 = vsel %vm2252_vm5, %v475_v60, 0 }
 0x14c   :  { %753 = vrot.lane.b32.xlu0 %v2360_v57, %s2155_s10  ;;  %619 = vrot.lane.b32.xlu1 %v2529_v4, %s2155_s10  ;;  %v407_v57 = vor.u32 %v405_v24, %v404_v13  ;;  %v393_v35 = vor.u32 %v391_v49, %v390_v51  ;;  %v400_v62 = vor.u32 %v398_v56, %v397_v6  ;;  %v2618_v15 = vrot.slane %v2583_v63, 1  ;;  %v2624_v13 = vpop.permute.xlu0 %821 }
 0x14d   :  { %v418_v49 = vrot.slane %v416_v37, 7  ;;  %v419_v51 = vshll.u32 %v1885_v22, 16  ;;  %v578_v60 = vshrl.u32 %v2583_v63, 16 }
 0x14e   :  { %v474_v46 = vsel %vm2248_vm2, 0, %v407_v57  ;;  %v473_v0 = vsel %vm2248_vm2, 0, %v400_v62  ;;  %v472_v2 = vsel %vm2248_vm2, 0, %v393_v35  ;;  %3111 = vst [vmem:[#allocation7_spill] sm:$0xff] %v2618_v15  ;;  %v273_v57 = vmax.f32 %v2473_v53, 0.0 }
 0x14f   :  { %v2570_v58 = vsel %vm2252_vm5, %v474_v46, 0  ;;  %v2595_v3 = vsel %vm2252_vm5, %v473_v0, 0  ;;  %v2599_v5 = vsel %vm2252_vm5, %v472_v2, 0  ;;  %v580_v46 = vshll.u32 %v2583_v63, 16 }
 0x150   :  { %785 = vrot.lane.b32.xlu0 %v2406_v20, %s2154_s9  ;;  %813 = vrot.lane.b32.xlu1 %v2545_v25, %s2156_s11  ;;  %v2573_v59 = vrot.slane %v2570_v58, 1  ;;  %v658_v7 = vrot.slane %v2599_v5, 1  ;;  %v573_v27 = vshll.u32 %v2570_v58, 16  ;;  %v2629_v24 = vrot.slane %v2595_v3, 1 }
 0x151   :  { %v571_v31 = vshrl.u32 %v2570_v58, 16  ;;  %v559_v33 = vshll.u32 %v2599_v5, 16  ;;  %v557_v44 = vshrl.u32 %v2599_v5, 16  ;;  %v435_v53 = vor.u32 %v433_v12, %v432_v36 }
 0x152   :  { %3110 = vst [vmem:[#allocation6_spill] sm:$0xff] %v2573_v59  ;;  %3112 = vst [vmem:[#allocation8_spill] sm:$0xff] %v2629_v24  ;;  %v575_v32 = vrot.slane %v573_v27, 1  ;;  %v1886_v55 = vpack.c.bf16 %v273_v57, %v273_v57  ;;  %v582_v62 = vrot.slane %v580_v46, 1  ;;  %v421_v2 = vor.u32 %v419_v51, %v418_v49 }
 0x153   :  { %v561_v45 = vrot.slane %v559_v33, 1  ;;  %v478_v0 = vsel %vm2248_vm2, 0, %v435_v53  ;;  %v566_v16 = vshll.u32 %v2595_v3, 16  ;;  %v439_v36 = vrot.slane %v437_v8, 7 }
 0x154   :  { %815 = vrot.lane.b32.xlu0 %v2553_v17, %s2156_s11  ;;  %615 = vrot.lane.b32.xlu1 %v2545_v25, %s2155_s10  ;;  %v2643_v43 = vor.u32 %v575_v32, %v571_v31  ;;  %v2666_v27 = vor.u32 %v582_v62, %v578_v60  ;;  %v2671_v22 = vsel %vm2252_vm5, %v478_v0, 0  ;;  %v476_v31 = vsel %vm2248_vm2, 0, %v421_v2 }
 0x155   :  { %v2655_v35 = vor.u32 %v561_v45, %v557_v44  ;;  %v426_v33 = vshll.u32 %v1886_v55, 16  ;;  %v440_v12 = vshll.u32 %v1888_v52, 16  ;;  %v564_v38 = vshrl.u32 %v2595_v3, 16 }
 0x156   :  { %v568_v44 = vrot.slane %v566_v16, 1  ;;  %v2686_v45 = vsel %vm2252_vm5, %v476_v31, 0 }
 0x157   :  { %v442_v53 = vor.u32 %v440_v12, %v439_v36 }
 0x158   :  { %617 = vrot.lane.b32.xlu0 %v2553_v17, %s2155_s10  ;;  %819 = vrot.lane.b32.xlu1 %v2562_v48, %s2156_s11  ;;  %v2697_v52 = vor.u32 %v568_v44, %v564_v38  ;;  %v599_v38 = vshrl.u32 %v2671_v22, 16 }
 0x159   :  { %v479_v62 = vsel %vm2248_vm2, 0, %v442_v53 }
 0x15a   :  { %v2719_v8 = vsel %vm2252_vm5, %v479_v62, 0 }
 0x15b   :  { %v3098_v31 = vrot.slane %v2719_v8, 1 }
 0x15c   :  { %685 = vrot.lane.b32.xlu0 %v2573_v59, %s2154_s9  ;;  %795 = vrot.lane.b32.xlu1 %v2570_v58, %s2154_s9 }
 0x160   :  { %719 = vrot.lane.b32.xlu0 %v2583_v63, %s2156_s11  ;;  %717 = vrot.lane.b32.xlu1 %v2570_v58, %s2156_s11 }
 0x164   :  { %793 = vrot.lane.b32.xlu0 %v2595_v3, %s2154_s9  ;;  %713 = vrot.lane.b32.xlu1 %v2599_v5, %s2156_s11 }
 0x168   :  { %681 = vrot.lane.b32.xlu0 %v658_v7, %s2154_s9  ;;  %765 = vrot.lane.b32.xlu1 %v2573_v59, %s2155_s10 }
 0x16c   :  { %715 = vrot.lane.b32.xlu0 %v2595_v3, %s2156_s11  ;;  %797 = vrot.lane.b32.xlu1 %v2583_v63, %s2154_s9 }
 0x170   :  { %767 = vrot.lane.b32.xlu0 %v2618_v15, %s2155_s10  ;;  %761 = vrot.lane.b32.xlu1 %v658_v7, %s2155_s10  ;;  %v423_v7 = vshrl.u32 %v1886_v55, 16  ;;  %v2695_v55 = vrot.slane %v2686_v45, 1 }
 0x172   :  { %v425_v32 = vrot.slane %v423_v7, 7  ;;  %3113 = vst [vmem:[#allocation9_spill] sm:$0xff] %v2695_v55 }
 0x174   :  { %763 = vrot.lane.b32.xlu0 %v2629_v24, %s2155_s10  ;;  %687 = vrot.lane.b32.xlu1 %v2618_v15, %s2154_s9  ;;  %v428_v46 = vor.u32 %v426_v33, %v425_v32  ;;  %v601_v32 = vshll.u32 %v2671_v22, 16  ;;  %v2731_v33 = vrot.slane %v2671_v22, 1  ;;  %v585_v15 = vshrl.u32 %v2686_v45, 16 }
 0x176   :  { %v2639_v40 = vpop.permute.xlu0 %701  ;;  %v2641_v42 = vpop.permute.xlu1 %779  ;;  %v477_v60 = vsel %vm2248_vm2, 0, %v428_v46  ;;  %v603_v44 = vrot.slane %v601_v32, 1  ;;  %v587_v46 = vshll.u32 %v2686_v45, 16 }
 0x177   :  { %v2711_v7 = vsel %vm2252_vm5, %v477_v60, 0 }
 0x178   :  { %825 = vrot.lane.b32.xlu0 %v2643_v43, %s2156_s11  ;;  %683 = vrot.lane.b32.xlu1 %v2629_v24, %s2154_s9  ;;  %3114 = vst [vmem:[#allocation10_spill] sm:$0xff] %v2711_v7  ;;  %v2734_v12 = vrot.slane %v2711_v7, 1  ;;  %v2749_v23 = vor.u32 %v603_v44, %v599_v38 }
 0x17a   :  { %v2651_v6 = vpop.permute.xlu1 %671  ;;  %v2653_v56 = vpop.permute.xlu0 %697 }
 0x17c   :  { %625 = vrot.lane.b32.xlu0 %v2643_v43, %s2155_s10  ;;  %621 = vrot.lane.b32.xlu1 %v2655_v35, %s2155_s10 }
 0x17e   :  { %v704_v10 = vpop.permute.xlu1 %703  ;;  %v2664_v14 = vpop.permute.xlu0 %749 }
 0x180   :  { %803 = vrot.lane.b32.xlu0 %v2671_v22, %s2154_s9  ;;  %827 = vrot.lane.b32.xlu1 %v2666_v27, %s2156_s11 }
 0x182   :  { %v2679_v37 = vpop.permute.xlu0 %781  ;;  %v2681_v57 = vpop.permute.xlu1 %667 }
 0x184   :  { %799 = vrot.lane.b32.xlu0 %v2686_v45, %s2154_s9  ;;  %627 = vrot.lane.b32.xlu1 %v2666_v27, %s2155_s10 }
 0x186   :  { %v2692_v49 = vpop.permute.xlu1 %699  ;;  %v746_v51 = vpop.permute.xlu0 %745 }
 0x188   :  { %689 = vrot.lane.b32.xlu0 %v2695_v55, %s2154_s9  ;;  %823 = vrot.lane.b32.xlu1 %v2697_v52, %s2156_s11 }
 0x18a   :  { %v2707_v0 = vpop.permute.xlu1 %751  ;;  %v778_v2 = vpop.permute.xlu0 %777 }
 0x18c   :  { %723 = vrot.lane.b32.xlu0 %v2711_v7, %s2156_s11  ;;  %623 = vrot.lane.b32.xlu1 %v2697_v52, %s2155_s10 }
 0x18e   :  { %v810_v16 = vpop.permute.xlu1 %809  ;;  %v2721_v18 = vpop.permute.xlu0 %673 }
 0x190   :  { %775 = vrot.lane.b32.xlu0 %v3098_v31, %s2155_s10  ;;  %721 = vrot.lane.b32.xlu1 %v2686_v45, %s2156_s11 }
 0x192   :  { %v612_v19 = vpop.permute.xlu1 %611  ;;  %v748_v36 = vpop.permute.xlu0 %747 }
 0x193   :  { %v845_v53 = vsel %vm837_vm6, %v2302_v11, %v612_v19  ;;  %v589_v11 = vrot.slane %v587_v46, 1  ;;  %v937_v44 = vsel %vm837_vm6, %v2499_v61, %v748_v36  ;;  %v934_v36 = vsel %vm837_vm6, %v2467_v50, %v746_v51 }
 0x194   :  { %v876_v60 = vsel %vm868_vm7, %v845_v53, %v2651_v6  ;;  %771 = vrot.lane.b32.xlu0 %v2734_v12, %s2155_s10  ;;  %773 = vrot.lane.b32.xlu1 %v2731_v33, %s2155_s10  ;;  %v983_v61 = vsel %vm868_vm7, %v937_v44, %v2641_v42 }
 0x195   :  { %v2747_v62 = vsel %vm899_vm8, %v876_v60, %v704_v10  ;;  %v2760_v53 = vor.u32 %v589_v11, %v585_v15  ;;  %v594_v10 = vshll.u32 %v2711_v7, 16  ;;  %v592_v15 = vshrl.u32 %v2711_v7, 16 }
 0x196   :  { %v670_v32 = vpop.permute.xlu0 %669  ;;  %v608_v31 = vpop.permute.xlu1 %607  ;;  %v1014_v42 = vsel %vm899_vm8, %v983_v61, %v810_v16 }
 0x197   :  { %v841_v38 = vsel %vm837_vm6, %v2322_v34, %v608_v31  ;;  %v596_v11 = vrot.slane %v594_v10, 1  ;;  %v839_v31 = vsel %vm837_vm6, %v2260_v21, %v2626_v41  ;;  %v981_v10 = vsel %vm868_vm7, %v934_v36, %v778_v2 }
 0x198   :  { %833 = vrot.lane.b32.xlu0 %v2749_v23, %s2156_s11  ;;  %769 = vrot.lane.b32.xlu1 %v2695_v55, %s2155_s10  ;;  %v2075_v55 = vunpack.i.l.bf16 %v2610_v9  ;;  %v872_v34 = vsel %vm868_vm7, %v841_v38, %v2681_v57  ;;  %v739_v41 = vshll.u32 %v2719_v8, 16 }
 0x199   :  { %v2791_v38 = vor.u32 %v596_v11, %v592_v15  ;;  %v903_v21 = vsel %vm899_vm8, %v872_v34, %v2692_v49 }
 0x19a   :  { %v2756_v6 = vpop.permute.xlu0 %811  ;;  %v2758_v19 = vpop.permute.xlu1 %787  ;;  %v2797_v59 = vsel %vm868_vm7, %v839_v31, %v2075_v55  ;;  %v737_v55 = vshrl.u32 %v2719_v8, 16 }
 0x19b   :  { %v901_v50 = vsel %vm899_vm8, %v2797_v59, %v2653_v56 }
 0x19c   :  { %829 = vrot.lane.b32.xlu0 %v2760_v53, %s2156_s11  ;;  %801 = vrot.lane.b32.xlu1 %v2711_v7, %s2154_s9  ;;  %v1812_v51 = vcombine.low %v901_v50, %v903_v21 }
 0x19e   :  { %v2771_v46 = vpop.permute.xlu0 %613  ;;  %v2773_v60 = vpop.permute.xlu1 %709 }
 0x1a0   :  { %633 = vrot.lane.b32.xlu0 %v2749_v23, %s2155_s10  ;;  %805 = vrot.lane.b32.xlu1 %v2719_v8, %s2154_s9 }
 0x1a2   :  { %v808_v24 = vpop.permute.xlu0 %807  ;;  %v784_v57 = vpop.permute.xlu1 %783 }
 0x1a3   :  { %v1012_v7 = vsel %vm899_vm8, %v981_v10, %v808_v24  ;;  %v741_v24 = vrot.slane %v739_v41, 1 }
 0x1a4   :  { %629 = vrot.lane.b32.xlu0 %v2760_v53, %s2155_s10  ;;  %831 = vrot.lane.b32.xlu1 %v2791_v38, %s2156_s11  ;;  %v1813_v49 = vcombine.low %v1012_v7, %v1014_v42  ;;  %v943_v42 = vsel %vm837_vm6, %v2486_v30, %v2707_v0 }
 0x1a5   :  { %v2819_v34 = vor.u32 %v741_v24, %v737_v55 }
 0x1a6   :  { %v610_v2 = vpop.permute.xlu0 %609  ;;  %v676_v44 = vpop.permute.xlu1 %675  ;;  %1368 = vmatprep.mubr.bf16.mxu1 %v1813_v49  ;;  %v987_v49 = vsel %vm868_vm7, %v943_v42, %v784_v57 }
 0x1a7   :  { %v843_v16 = vsel %vm837_vm6, %v2317_v26, %v610_v2  ;;  %1369 = vmatmul.mubr.bf16.vlgmr.msra.gmra.mrb[0].mxu1 %v1812_v51 }
 0x1a8   :  { %v874_v56 = vsel %vm868_vm7, %v843_v16, %v670_v32  ;;  %691 = vrot.lane.b32.xlu0 %v2734_v12, %s2154_s9  ;;  %693 = vrot.lane.b32.xlu1 %v2731_v33, %s2154_s9 }
 0x1a9   :  { %v905_v7 = vsel %vm899_vm8, %v874_v56, %v2639_v40  ;;  %2063 = vmatpush3.bf16.msra.mxu1 %v2275_v28 }
 0x1aa   :  { %v706_v15 = vpop.permute.xlu0 %705  ;;  %v708_v11 = vpop.permute.xlu1 %707  ;;  %v1815_v26 = vcombine.low %v905_v7, %v2747_v62  ;;  %2062 = vmatprep.subr.bf16.mxu1 %v2282_v29 }
 0x1ac   :  { %835 = vrot.lane.b32.xlu0 %v2819_v34, %s2156_s11  ;;  %631 = vrot.lane.b32.xlu1 %v2791_v38, %s2155_s10 }
 0x1ad   :  { %2064 = vmatpush3.bf16.msra.mxu1 %v2282_v29  ;;  %v940_v29 = vsel %vm837_vm6, %v2439_v39, %v2664_v14 }
 0x1ae   :  { %v758_v32 = vpop.permute.xlu0 %757  ;;  %v760_v40 = vpop.permute.xlu1 %759  ;;  %v985_v50 = vsel %vm868_vm7, %v940_v29, %v2679_v37 }
 0x1af   :  { %v1016_v55 = vsel %vm899_vm8, %v985_v50, %v2756_v6  ;;  %v955_v6 = vsel %vm837_vm6, %v2562_v48, %v760_v40  ;;  %v952_v48 = vsel %vm837_vm6, %v2529_v4, %v758_v32 }
 0x1b0   :  { %727 = vrot.lane.b32.xlu0 %v2719_v8, %s2156_s11  ;;  %725 = vrot.lane.b32.xlu1 %v2671_v22, %s2156_s11 }
 0x1b2   :  { %v790_v28 = vpop.permute.xlu0 %789  ;;  %v756_v62 = vpop.permute.xlu1 %755 }
 0x1b3   :  { %v949_v24 = vsel %vm837_vm6, %v2553_v17, %v756_v62 }
 0x1b4   :  { %v991_v30 = vsel %vm868_vm7, %v949_v24, %v2758_v19  ;;  %v847_v19 = vsel %vm837_vm6, %v2339_v47, %v2771_v46 }
 0x1b5   :  { %v878_v47 = vsel %vm868_vm7, %v847_v19, %v2721_v18 }
 0x1b6   :  { %v680_v31 = vpop.permute.xlu0 %679  ;;  %v678_v61 = vpop.permute.xlu1 %677 }
 0x1ba   :  { %v712_v36 = vpop.permute.xlu0 %711  ;;  %v818_v10 = vpop.permute.xlu1 %817 }
 0x1bb   :  { %v1022_v56 = vsel %vm899_vm8, %v991_v30, %v818_v10  ;;  %v993_v10 = vsel %vm868_vm7, %v952_v48, %v790_v28 }
 0x1be   :  { %v754_v21 = vpop.permute.xlu0 %753  ;;  %v620_v41 = vpop.permute.xlu1 %619 }
 0x1bf   :  { %v946_v14 = vsel %vm837_vm6, %v2545_v25, %v754_v21  ;;  %v2076_v25 = vunpack.i.h.bf16 %v2610_v9  ;;  %v853_v28 = vsel %vm837_vm6, %v2369_v1, %v620_v41 }
 0x1c1   :  { %v995_v40 = vsel %vm868_vm7, %v955_v6, %v2076_v25 }
 0x1c2   :  { %v786_v51 = vpop.permute.xlu0 %785  ;;  %v814_v2 = vpop.permute.xlu1 %813  ;;  %v1026_v32 = vsel %vm899_vm8, %v995_v40, %v2624_v13 }
 0x1c3   :  { %v1018_v16 = vsel %vm899_vm8, %v987_v49, %v814_v2  ;;  %v989_v37 = vsel %vm868_vm7, %v946_v14, %v786_v51 }
 0x1c4   :  { %v1816_v39 = vcombine.low %v1016_v55, %v1018_v16 }
 0x1c6   :  { %v816_v0 = vpop.permute.xlu0 %815  ;;  %v616_v57 = vpop.permute.xlu1 %615  ;;  %1376 = vmatprep.mubr.bf16.mxu1 %v1816_v39 }
 0x1c7   :  { %v1020_v17 = vsel %vm899_vm8, %v989_v37, %v816_v0  ;;  %v849_v7 = vsel %vm837_vm6, %v2354_v54, %v616_v57  ;;  %1377 = vmatmul.mubr.bf16.gmra.mrb[4].mxu1 %v1815_v26 }
 0x1c8   :  { %v1819_v62 = vcombine.low %v1020_v17, %v1022_v56  ;;  %v880_v21 = vsel %vm868_vm7, %v849_v7, %v676_v44  ;;  %v909_v44 = vsel %vm899_vm8, %v878_v47, %v706_v15  ;;  %v884_v15 = vsel %vm868_vm7, %v853_v28, %v680_v31 }
 0x1c9   :  { %v911_v29 = vsel %vm899_vm8, %v880_v21, %v708_v11  ;;  %v915_v55 = vsel %vm899_vm8, %v884_v15, %v712_v36 }
 0x1ca   :  { %v618_v54 = vpop.permute.xlu0 %617  ;;  %v820_v26 = vpop.permute.xlu1 %819  ;;  %1384 = vmatprep.mubr.bf16.mxu1 %v1819_v62  ;;  %v1818_v42 = vcombine.low %v909_v44, %v911_v29 }
 0x1cb   :  { %v1024_v46 = vsel %vm899_vm8, %v993_v10, %v820_v26  ;;  %v851_v4 = vsel %vm837_vm6, %v2406_v20, %v618_v54 }
 0x1cc   :  { %v1822_v50 = vcombine.low %v1024_v46, %v1026_v32  ;;  %v882_v18 = vsel %vm868_vm7, %v851_v4, %v678_v61 }
 0x1cd   :  { %v913_v2 = vsel %vm899_vm8, %v882_v18, %v2773_v60 }
 0x1ce   :  { %v2879_v49 = vpop.permute.xlu0 %685  ;;  %v796_v11 = vpop.permute.xlu1 %795  ;;  %v1821_v1 = vcombine.low %v913_v2, %v915_v55 }
 0x1cf   :  { %1385 = vmatmul.mubr.bf16.gmra.mrb[8].mxu1 %v1818_v42 }
 0x1d0   :  { %1392 = vmatprep.mubr.bf16.mxu1 %v1822_v50 }
 0x1d2   :  { %v2883_v51 = vpop.permute.xlu0 %719  ;;  %v2885_v20 = vpop.permute.xlu1 %717 }
 0x1d6   :  { %v794_v41 = vpop.permute.xlu0 %793  ;;  %v714_v24 = vpop.permute.xlu1 %713 }
 0x1d7   :  { %1393 = vmatmul.mubr.bf16.gmra.mrb[12].mxu1 %v1821_v1 }
 0x1da   :  { %v682_v16 = vpop.permute.xlu0 %681  ;;  %v766_v39 = vpop.permute.xlu1 %765 }
 0x1de   :  { %v716_v61 = vpop.permute.xlu0 %715  ;;  %v798_v14 = vpop.permute.xlu1 %797 }
 0x1e2   :  { %v768_v30 = vpop.permute.xlu0 %767  ;;  %v762_v37 = vpop.permute.xlu1 %761 }
 0x1e3   :  { %v958_v46 = vsel %vm837_vm6, %v2655_v35, %v762_v37  ;;  %v917_v35 = vsel %vm899_vm8, %v2797_v59, %v714_v24  ;;  %v964_v24 = vsel %vm837_vm6, %v2643_v43, %v766_v39 }
 0x1e4   :  { %v2890_v31 = vpop.f32.mrb[16].mxu0  ;;  %v997_v28 = vsel %vm868_vm7, %v958_v46, %v794_v41 }
 0x1e5   :  { %v2892_v0 = vpop.f32.mrb[17].mxu0 }
 0x1e6   :  { %v2894_v57 = vpop.f32.mrb[18].mxu0  ;;  %v764_v6 = vpop.permute.xlu0 %763 }
 0x1e7   :  { %v2896_v60 = vpop.permute.xlu1 %687  ;;  %v2898_v36 = vpop.f32.mrb[19].mxu0  ;;  %v961_v44 = vsel %vm837_vm6, %v2697_v52, %v764_v6 }
 0x1e8   :  { %v999_v42 = vsel %vm868_vm7, %v961_v44, %v796_v11  ;;  %v1001_v44 = vsel %vm868_vm7, %v964_v24, %v798_v14  ;;  %v3116_v24 = vld [vmem:[#allocation6_spill] sm:$0xff] }
 0x1ea   :  { %v826_v56 = vpop.permute.xlu0 %825 }
 0x1eb   :  { %v684_v17 = vpop.permute.xlu1 %683 }
 0x1ec   :  { %v2900_v7 = vpop.f32.mrb[20].mxu0 }
 0x1ed   :  { %v2902_v62 = vpop.f32.mrb[21].mxu0 }
 0x1ee   :  { %v626_v19 = vpop.permute.xlu0 %625  ;;  %v2904_v48 = vpop.f32.mrb[22].mxu0 }
 0x1ef   :  { %v622_v21 = vpop.permute.xlu1 %621  ;;  %v2906_v40 = vpop.f32.mrb[23].mxu0  ;;  %v859_v6 = vsel %vm837_vm6, %v2570_v58, %v626_v19 }
 0x1f0   :  { %v855_v26 = vsel %vm837_vm6, %v2599_v5, %v622_v21  ;;  %v1030_v5 = vsel %vm899_vm8, %v999_v42, %v826_v56  ;;  %v890_v46 = vsel %vm868_vm7, %v859_v6, %v2879_v49 }
 0x1f1   :  { %v886_v4 = vsel %vm868_vm7, %v855_v26, %v682_v16  ;;  %v967_v26 = vsel %vm837_vm6, %v2666_v27, %v768_v30  ;;  %v923_v27 = vsel %vm899_vm8, %v890_v46, %v2883_v51 }
 0x1f2   :  { %v804_v10 = vpop.permute.xlu0 %803  ;;  %v919_v18 = vsel %vm899_vm8, %v886_v4, %v716_v61 }
 0x1f3   :  { %v828_v54 = vpop.permute.xlu1 %827  ;;  %v1824_v52 = vcombine.low %v917_v35, %v919_v18 }
 0x1f6   :  { %v800_v29 = vpop.permute.xlu0 %799 }
 0x1f7   :  { %v628_v47 = vpop.permute.xlu1 %627 }
 0x1fa   :  { %v690_v32 = vpop.permute.xlu0 %689 }
 0x1fb   :  { %v824_v50 = vpop.permute.xlu1 %823 }
 0x1fc   :  { %v1028_v15 = vsel %vm899_vm8, %v997_v28, %v824_v50 }
 0x1fd   :  { %v1825_v2 = vcombine.low %v1028_v15, %v1030_v5 }
 0x1fe   :  { %v724_v55 = vpop.permute.xlu0 %723 }
 0x1ff   :  { %v624_v1 = vpop.permute.xlu1 %623  ;;  %1400 = vmatprep.mubr.bf16.mxu1 %v1825_v2 }
 0x200   :  { %1401 = vmatmul.mubr.bf16.gmra.mrb[16].mxu1 %v1824_v52  ;;  %v857_v61 = vsel %vm837_vm6, %v2595_v3, %v624_v1  ;;  %v1003_v3 = vsel %vm868_vm7, %v967_v26, %v800_v29  ;;  %v3117_v26 = vld [vmem:[#allocation8_spill] sm:$0xff] }
 0x201   :  { %v888_v21 = vsel %vm868_vm7, %v857_v61, %v684_v17  ;;  %v1032_v17 = vsel %vm899_vm8, %v1001_v44, %v828_v54  ;;  %v3115_v61 = vld [vmem:[#allocation10_spill] sm:$0xff]  ;;  %v1826_v46 = vcombine.low %v3117_v26, %v3116_v24  ;;  %v2111_v44 = vld [vmem:[%s3095_s5] sm:$0xff]  }
 0x202   :  { %v776_v16 = vpop.permute.xlu0 %775  ;;  %v921_v58 = vsel %vm899_vm8, %v888_v21, %v2885_v20  ;;  %v861_v20 = vsel %vm837_vm6, %v2583_v63, %v628_v47  ;;  %2041 = vmatprep.subr.bf16.mxu0 %v2111_v44 }
 0x203   :  { %v722_v11 = vpop.permute.xlu1 %721  ;;  %v1827_v39 = vcombine.low %v921_v58, %v923_v27  ;;  %v892_v5 = vsel %vm868_vm7, %v861_v20, %v2896_v60  ;;  %2042 = vmatpush3.bf16.msra.mxu0 %v2111_v44 }
 0x206   :  { %v772_v37 = vpop.permute.xlu0 %771 }
 0x207   :  { %v774_v41 = vpop.permute.xlu1 %773  ;;  %v973_v14 = vsel %vm837_vm6, %v2791_v38, %v772_v37 }
 0x208   :  { %v1007_v28 = vsel %vm868_vm7, %v973_v14, %v804_v10  ;;  %v925_v10 = vsel %vm899_vm8, %v892_v5, %v722_v11 }
 0x20a   :  { %v834_v56 = vpop.permute.xlu0 %833 }
 0x20b   :  { %v770_v59 = vpop.permute.xlu1 %769  ;;  %v1038_v38 = vsel %vm899_vm8, %v1007_v28, %v834_v56 }
 0x20c   :  { %v970_v54 = vsel %vm837_vm6, %v2760_v53, %v770_v59  ;;  %v979_v53 = vsel %vm837_vm6, %v2819_v34, %v776_v16 }
 0x20d   :  { %v1010_v60 = vsel %vm868_vm7, %v979_v53, %v2076_v25 }
 0x20e   :  { %v830_v4 = vpop.permute.xlu0 %829  ;;  %v1041_v16 = vsel %vm899_vm8, %v1010_v60, %v2624_v13 }
 0x20f   :  { %v1034_v19 = vsel %vm899_vm8, %v1003_v3, %v830_v4  ;;  %v802_v42 = vpop.permute.xlu1 %801  ;;  %v3118_v3 = vld [vmem:[#allocation9_spill] sm:$0xff]  ;;  %v3119_v4 = vld [vmem:[#allocation7_spill] sm:$0xff] }
 0x210   :  { %v1828_v43 = vcombine.low %v1032_v17, %v1034_v19  ;;  %v1005_v50 = vsel %vm868_vm7, %v970_v54, %v802_v42  ;;  %v1829_v58 = vcombine.low %v3119_v4, %v3118_v3  ;;  %v1832_v17 = vcombine.low %v2734_v12, %v2731_v33  ;;  %v3120_v19 = vld [vmem:[#allocation5_spill] sm:$0xff] }
 0x211   :  { %v3121_v42 = vrot.slane %v2719_v8, 1 }
 0x212   :  { %v634_v30 = vpop.permute.xlu0 %633  ;;  %1408 = vmatprep.mubr.bf16.mxu1 %v1828_v43 }
 0x213   :  { %v806_v49 = vpop.permute.xlu1 %805  ;;  %1409 = vmatmul.mubr.bf16.gmra.mrb[20].mxu1 %v1827_v39  ;;  %v867_v9 = vsel %vm837_vm6, %v2671_v22, %v634_v30  ;;  %v2112_v22 = vld [vmem:[%s3095_s5 + $0x8] sm:$0xff]   ;;  %v1835_v43 = vcombine.low %v3121_v42, %v3120_v19  ;;  %v2999_v39 = vld [vmem:[%s3094_s4] ss:$0 sm:$0xff] }
 0x214   :  { %2043 = vmatprep.subr.bf16.mxu0 %v2112_v22 }
 0x215   :  { %2044 = vmatpush3.bf16.msra.mxu0 %v2112_v22 }
 0x216   :  { %v630_v29 = vpop.permute.xlu0 %629 }
 0x217   :  { %v863_v51 = vsel %vm837_vm6, %v2686_v45, %v630_v29  ;;  %v832_v18 = vpop.permute.xlu1 %831 }
 0x218   :  { %v894_v15 = vsel %vm868_vm7, %v863_v51, %v690_v32  ;;  %v1036_v63 = vsel %vm899_vm8, %v1005_v50, %v832_v18  ;;  %v976_v32 = vsel %vm837_vm6, %v2749_v23, %v774_v41 }
 0x219   :  { %v1831_v47 = vcombine.low %v1036_v63, %v1038_v38  ;;  %v927_v35 = vsel %vm899_vm8, %v894_v15, %v724_v55  ;;  %v1009_v1 = vsel %vm868_vm7, %v976_v32, %v806_v49 }
 0x21a   :  { %v692_v2 = vpop.permute.xlu0 %691  ;;  %v1830_v45 = vcombine.low %v925_v10, %v927_v35 }
 0x21b   :  { %v694_v52 = vpop.permute.xlu1 %693  ;;  %1416 = vmatprep.mubr.bf16.mxu1 %v1831_v47 }
 0x21c   :  { %1417 = vmatmul.mubr.bf16.gmra.mrb[24].mxu1 %v1830_v45  ;;  %v898_v25 = vsel %vm868_vm7, %v867_v9, %v694_v52 }
 0x21e   :  { %v836_v34 = vpop.permute.xlu0 %835 }
 0x21f   :  { %v1040_v55 = vsel %vm899_vm8, %v1009_v1, %v836_v34  ;;  %v632_v11 = vpop.permute.xlu1 %631 }
 0x220   :  { %v1834_v37 = vcombine.low %v1040_v55, %v1041_v16  ;;  %v865_v6 = vsel %vm837_vm6, %v3115_v61, %v632_v11 }
 0x221   :  { %v896_v41 = vsel %vm868_vm7, %v865_v6, %v692_v2 }
 0x222   :  { %v728_v56 = vpop.permute.xlu0 %727  ;;  %1424 = vmatprep.mubr.bf16.mxu1 %v1834_v37 }
 0x223   :  { %v931_v23 = vsel %vm899_vm8, %v898_v25, %v728_v56  ;;  %v726_v21 = vpop.permute.xlu1 %725 }
 0x224   :  { %v929_v13 = vsel %vm899_vm8, %v896_v41, %v726_v21 }
 0x225   :  { %v1833_v59 = vcombine.low %v929_v13, %v931_v23 }
 0x227   :  { %1425 = vmatmul.mubr.bf16.gmra.mrb[28].mxu1 %v1833_v59 }
 0x228   :  { %2033 = vmatprep.mubr.msk.bf16.mxu1 %vm837_vm6, %v1826_v46 }
 0x22f   :  { %2034 = vmatmul.mubr.msk.bf16.vlgmr.msra.gmra.mrb[32].mxu1 %vm837_vm6, %v1829_v58 }
 0x230   :  { %2037 = vmatprep.mubr.msk.bf16.mxu1 %vm837_vm6, %v1832_v17 }
 0x237   :  { %2038 = vmatmul.mubr.msk.bf16.gmra.mrb[36].mxu1 %vm837_vm6, %v1835_v43 }
 0x27a   :  { %v1921_v27 = vpop.f32.mrb[0].mxu1 }
 0x27b   :  { %v1922_v30 = vpop.f32.mrb[1].mxu1 }
 0x27c   :  { %v1923_v49 = vadd.f32 %v1922_v30, %v1921_v27  ;;  %v1924_v14 = vpop.f32.mrb[2].mxu1 }
 0x27d   :  { %v1925_v33 = vpop.f32.mrb[3].mxu1 }
 0x27e   :  { %v1371_v12 = vadd.f32 %v1923_v49, %v2999_v39  ;;  %v1926_v20 = vadd.f32 %v1925_v33, %v1924_v14 }
 0x280   :  { %v1468_v54 = vadd.f32 %v2892_v0, %v1371_v12  ;;  %v1374_v8 = vadd.f32 %v1926_v20, %v2999_v39 }
 0x282   :  { %v1471_v29 = vadd.f32 %v2898_v36, %v1374_v8  ;;  %v1530_v28 = vmax.f32 %v1468_v54, 0.0 }
 0x284   :  { %v1531_v50 = vmax.f32 %v1471_v29, 0.0 }
 0x286   :  { %v1546_v51 = vpack.c.bf16 %v1531_v50, %v1530_v28 }
 0x288   :  { %2045 = vmatprep.mubr.msk.bf16.mxu0 %vm837_vm6, %v1546_v51 }
 0x29a   :  { %v1927_v18 = vpop.f32.mrb[4].mxu1 }
 0x29b   :  { %v1928_v5 = vpop.f32.mrb[5].mxu1 }
 0x29c   :  { %v1929_v38 = vadd.f32 %v1928_v5, %v1927_v18  ;;  %v1930_v15 = vpop.f32.mrb[6].mxu1 }
 0x29d   :  { %v1931_v63 = vpop.f32.mrb[7].mxu1 }
 0x29e   :  { %v1379_v53 = vadd.f32 %v1929_v38, %v2999_v39  ;;  %v1932_v10 = vadd.f32 %v1931_v63, %v1930_v15 }
 0x2a0   :  { %v1476_v47 = vadd.f32 %v2890_v31, %v1379_v53  ;;  %v1382_v0 = vadd.f32 %v1932_v10, %v2999_v39 }
 0x2a2   :  { %v1479_v35 = vadd.f32 %v2894_v57, %v1382_v0  ;;  %v1933_v36 = vpop.f32.mrb[8].mxu1  ;;  %v1532_v45 = vmax.f32 %v1476_v47, 0.0 }
 0x2a3   :  { %v1934_v2 = vpop.f32.mrb[9].mxu1 }
 0x2a4   :  { %v1533_v52 = vmax.f32 %v1479_v35, 0.0  ;;  %v1935_v60 = vadd.f32 %v1934_v2, %v1933_v36  ;;  %v1936_v32 = vpop.f32.mrb[10].mxu1 }
 0x2a5   :  { %v1937_v1 = vpop.f32.mrb[11].mxu1 }
 0x2a6   :  { %v1547_v34 = vpack.c.bf16 %v1533_v52, %v1532_v45  ;;  %v1387_v16 = vadd.f32 %v1935_v60, %v2999_v39  ;;  %v1938_v55 = vadd.f32 %v1937_v1, %v1936_v32 }
 0x2a8   :  { %v1484_v11 = vadd.f32 %v2902_v62, %v1387_v16  ;;  %v1390_v37 = vadd.f32 %v1938_v55, %v2999_v39  ;;  %2046 = vmatmul.mubr.msk.bf16.vlgmr.msra.gmra.mrb[24].mxu0 %vm837_vm6, %v1547_v34 }
 0x2aa   :  { %v1487_v31 = vadd.f32 %v2906_v40, %v1390_v37  ;;  %v1939_v57 = vpop.f32.mrb[12].mxu1  ;;  %v1534_v6 = vmax.f32 %v1484_v11, 0.0 }
 0x2ab   :  { %v1940_v61 = vpop.f32.mrb[13].mxu1 }
 0x2ac   :  { %v1535_v9 = vmax.f32 %v1487_v31, 0.0  ;;  %v1941_v25 = vadd.f32 %v1940_v61, %v1939_v57  ;;  %v1942_v56 = vpop.f32.mrb[14].mxu1 }
 0x2ad   :  { %v1943_v23 = vpop.f32.mrb[15].mxu1 }
 0x2ae   :  { %v1548_v41 = vpack.c.bf16 %v1535_v9, %v1534_v6  ;;  %v1395_v21 = vadd.f32 %v1941_v25, %v2999_v39  ;;  %v1944_v13 = vadd.f32 %v1943_v23, %v1942_v56 }
 0x2b0   :  { %v1492_v59 = vadd.f32 %v2900_v7, %v1395_v21  ;;  %v1398_v62 = vadd.f32 %v1944_v13, %v2999_v39  ;;  %2049 = vmatprep.mubr.msk.bf16.mxu0 %vm837_vm6, %v1548_v41 }
 0x2b2   :  { %v1495_v24 = vadd.f32 %v2904_v48, %v1398_v62  ;;  %v1536_v40 = vmax.f32 %v1492_v59, 0.0 }
 0x2b4   :  { %v1537_v26 = vmax.f32 %v1495_v24, 0.0 }
 0x2b6   :  { %v1549_v46 = vpack.c.bf16 %v1537_v26, %v1536_v40  ;;  %v3036_v40 = vld [vmem:[%s3096_s6] ss:$0 sm:$0xff] }
 0x2b8   :  { %2050 = vmatmul.mubr.msk.bf16.gmra.mrb[28].mxu0 %vm837_vm6, %v1549_v46  ;;  %v2122_v46 = vld [vmem:[%s3090_s0] sm:$0xff]  }
 0x2d3   :  { %v1945_v44 = vpop.f32.mrb[16].mxu1 }
 0x2d4   :  { %v1946_v22 = vpop.f32.mrb[17].mxu1 }
 0x2d5   :  { %v1947_v3 = vadd.f32 %v1946_v22, %v1945_v44  ;;  %v1948_v4 = vpop.f32.mrb[18].mxu1  ;;  %v1558_v44 = vunpack.c.l.bf16 %v2122_v46 }
 0x2d6   :  { %v1949_v58 = vpop.f32.mrb[19].mxu1 }
 0x2d7   :  { %v1950_v17 = vadd.f32 %v1949_v58, %v1948_v4  ;;  %v1403_v38 = vadd.f32 %v1947_v3, %v2999_v39 }
 0x2d9   :  { %v1406_v0 = vadd.f32 %v1950_v17, %v2999_v39  ;;  %v1559_v17 = vunpack.c.h.bf16 %v2122_v46  ;;  %v2127_v46 = vld [vmem:[%s3090_s0 + $0x38] sm:$0xff]  }
 0x2e6   :  { %v1951_v19 = vpop.f32.mrb[20].mxu1 }
 0x2e7   :  { %v1952_v42 = vpop.f32.mrb[21].mxu1 }
 0x2e8   :  { %v1953_v7 = vadd.f32 %v1952_v42, %v1951_v19  ;;  %v1954_v43 = vpop.f32.mrb[22].mxu1 }
 0x2e9   :  { %v1955_v27 = vpop.f32.mrb[23].mxu1 }
 0x2ea   :  { %v1956_v30 = vadd.f32 %v1955_v27, %v1954_v43  ;;  %v1411_v18 = vadd.f32 %v1953_v7, %v2999_v39 }
 0x2ec   :  { %v1414_v53 = vadd.f32 %v1956_v30, %v2999_v39 }
 0x2ef   :  { %v1957_v49 = vpop.f32.mrb[24].mxu1 }
 0x2f0   :  { %v1958_v14 = vpop.f32.mrb[25].mxu1 }
 0x2f1   :  { %v1959_v48 = vadd.f32 %v1958_v14, %v1957_v49  ;;  %v1960_v33 = vpop.f32.mrb[26].mxu1 }
 0x2f2   :  { %v1961_v12 = vpop.f32.mrb[27].mxu1 }
 0x2f3   :  { %v1962_v20 = vadd.f32 %v1961_v12, %v1960_v33  ;;  %v1419_v11 = vadd.f32 %v1959_v48, %v2999_v39 }
 0x2f5   :  { %v1422_v9 = vadd.f32 %v1962_v20, %v2999_v39 }
 0x2fa   :  { %v1963_v54 = vpop.f32.mrb[28].mxu1 }
 0x2fb   :  { %v1964_v8 = vpop.f32.mrb[29].mxu1 }
 0x2fc   :  { %v1965_v29 = vadd.f32 %v1964_v8, %v1963_v54  ;;  %v1966_v28 = vpop.f32.mrb[30].mxu1  ;;  %v2123_v8 = vld [vmem:[%s3090_s0 + $0x18] sm:$0xff]  }
 0x2fd   :  { %v1967_v50 = vpop.f32.mrb[31].mxu1 }
 0x2fe   :  { %v1968_v51 = vadd.f32 %v1967_v50, %v1966_v28  ;;  %v1427_v34 = vadd.f32 %v1965_v29, %v2999_v39  ;;  %v1564_v29 = vunpack.c.l.bf16 %v2123_v8  ;;  %v2124_v50 = vld [vmem:[%s3090_s0 + $0x10] sm:$0xff]  }
 0x300   :  { %v1430_v57 = vadd.f32 %v1968_v51, %v2999_v39  ;;  %v2121_v39 = vld [vmem:[%s3090_s0 + $0x8] sm:$0xff]   ;;  %v1562_v51 = vunpack.c.l.bf16 %v2124_v50 }
 0x301   :  { %v1560_v26 = vunpack.c.l.bf16 %v2121_v39  ;;  %v1561_v58 = vunpack.c.h.bf16 %v2121_v39 }
 0x302   :  { %v2035_v5 = vpop.f32.mrb[32].mxu1 }
 0x303   :  { %v1508_v15 = vadd.f32 %v2035_v5, %v1411_v18  ;;  %v1499_v63 = vpop.f32.mrb[33].mxu1 }
 0x304   :  { %v1500_v10 = vadd.f32 %v1499_v63, %v1403_v38  ;;  %v2036_v47 = vpop.f32.mrb[34].mxu1  ;;  %v1565_v38 = vunpack.c.h.bf16 %v2123_v8 }
 0x305   :  { %v1511_v35 = vadd.f32 %v2036_v47, %v1414_v53  ;;  %v1502_v36 = vpop.f32.mrb[35].mxu1  ;;  %v1540_v45 = vmax.f32 %v1508_v15, 0.0  ;;  %v1563_v53 = vunpack.c.h.bf16 %v2124_v50 }
 0x306   :  { %v1503_v2 = vadd.f32 %v1502_v36, %v1406_v0  ;;  %v1538_v60 = vmax.f32 %v1500_v10, 0.0 }
 0x307   :  { %v1541_v52 = vmax.f32 %v1511_v35, 0.0 }
 0x308   :  { %v1539_v32 = vmax.f32 %v1503_v2, 0.0 }
 0x309   :  { %v1551_v1 = vpack.c.bf16 %v1541_v52, %v1540_v45 }
 0x30a   :  { %v1550_v16 = vpack.c.bf16 %v1539_v32, %v1538_v60  ;;  %v2039_v55 = vpop.f32.mrb[36].mxu1 }
 0x30b   :  { %v1524_v37 = vadd.f32 %v2039_v55, %v1427_v34  ;;  %v1515_v31 = vpop.f32.mrb[37].mxu1  ;;  %v2125_v34 = vld [vmem:[%s3090_s0 + $0x28] sm:$0xff]  }
 0x30c   :  { %v1516_v61 = vadd.f32 %v1515_v31, %v1419_v11  ;;  %v2040_v6 = vpop.f32.mrb[38].mxu1  ;;  %2053 = vmatprep.mubr.msk.bf16.mxu0 %vm837_vm6, %v1550_v16  ;;  %v1568_v16 = vunpack.c.l.bf16 %v2125_v34  ;;  %v2126_v11 = vld [vmem:[%s3090_s0 + $0x20] sm:$0xff]  }
 0x30d   :  { %v1527_v25 = vadd.f32 %v2040_v6, %v1430_v57  ;;  %v1518_v56 = vpop.f32.mrb[39].mxu1  ;;  %2054 = vmatmul.mubr.msk.bf16.gmra.mrb[32].mxu0 %vm837_vm6, %v1551_v1  ;;  %v1544_v41 = vmax.f32 %v1524_v37, 0.0  ;;  %v1566_v37 = vunpack.c.l.bf16 %v2126_v11 }
 0x30e   :  { %v1519_v23 = vadd.f32 %v1518_v56, %v1422_v9  ;;  %v1542_v13 = vmax.f32 %v1516_v61, 0.0  ;;  %v1569_v61 = vunpack.c.h.bf16 %v2125_v34 }
 0x30f   :  { %v1545_v21 = vmax.f32 %v1527_v25, 0.0  ;;  %v1567_v25 = vunpack.c.h.bf16 %v2126_v11 }
 0x310   :  { %v1543_v59 = vmax.f32 %v1519_v23, 0.0 }
 0x311   :  { %v1553_v62 = vpack.c.bf16 %v1545_v21, %v1544_v41 }
 0x312   :  { %v1552_v24 = vpack.c.bf16 %v1543_v59, %v1542_v13 }
 0x314   :  { %2057 = vmatprep.mubr.msk.bf16.mxu0 %vm837_vm6, %v1552_v24 }
 0x315   :  { %2058 = vmatmul.mubr.msk.bf16.gmra.mrb[36].mxu0 %vm837_vm6, %v1553_v62 }
 0x37b   :  { %v2047_v22 = vpop.f32.mrb[24].mxu0 }
 0x37c   :  { %v1660_v3 = vadd.f32 %v2047_v22, %v3036_v40  ;;  %v1651_v4 = vpop.f32.mrb[25].mxu0 }
 0x37d   :  { %v1652_v19 = vadd.f32 %v3036_v40, %v1651_v4  ;;  %v2048_v42 = vpop.f32.mrb[26].mxu0  ;;  %v2128_v4 = vld [vmem:[%s3090_s0 + $0x30] sm:$0xff]   ;;  %s2157_s0 = smov [#allocation2]  }
 0x37e   :  { %v1716_v7 = vadd.f32 %v1660_v3, %v1560_v26  ;;  %v1663_v43 = vadd.f32 %v2048_v42, %v3036_v40  ;;  %v1654_v27 = vpop.f32.mrb[27].mxu0  ;;  %v1573_v42 = vunpack.c.h.bf16 %v2127_v46  ;;  %s1767_s22 = sshll.u32 %s2157_s0, 4  ;;  %s1768_s22 = int_to_ptr.vmem [resolvable:$true] %s1767_s22 }
 0x37f   :  { %v1714_v30 = vadd.f32 %v1652_v19, %v1558_v44  ;;  %v1655_v49 = vadd.f32 %v3036_v40, %v1654_v27  ;;  %v1572_v44 = vunpack.c.l.bf16 %v2127_v46  ;;  %v1571_v27 = vunpack.c.h.bf16 %v2128_v4  ;;  %s2129_s23 = scalar_lea.vmem %s1768_s22, 2048  ;;  %p2134_p1 = scmp.lt.s32.totalorder %s1768_s22, %s1768_s22 }
 0x380   :  { %v1732_v14 = vmax.f32 %v1716_v7, 0.0  ;;  %v1717_v48 = vadd.f32 %v1663_v43, %v1561_v58  ;;  %v1570_v58 = vunpack.c.l.bf16 %v2128_v4  ;;  %p2130_p0 = scmp.ne.s32.totalorder %s1768_s22, %s2129_s23  ;;  %p2135_p2 = scmp.lt.s32.totalorder %s2129_s23, %s2129_s23 }
 0x381   :  { %v1730_v33 = vmax.f32 %v1714_v30, 0.0  ;;  %v1715_v12 = vadd.f32 %v1655_v49, %v1559_v17 }
 0x382   :  { %1748 = vst [vmem:[#allocation2 + $0x10] sm:$0xff] %v1732_v14  ;;  %v1733_v20 = vmax.f32 %v1717_v48, 0.0  ;;  %p2136_p3 = por %p2135_p2, %p2134_p1 }
 0x383   :  { %1746 = vst [vmem:[#allocation2] sm:$0xff] %v1730_v33  ;;  %v1731_v54 = vmax.f32 %v1715_v12, 0.0 }
 0x384   :  { %1749 = vst [vmem:[#allocation2 + $0x18] sm:$0xff] %v1733_v20  ;;  %p2137_p4 = pnand %p2136_p3, %p2130_p0 }
 0x385   :  { %1747 = vst [vmem:[#allocation2 + $0x8] sm:$0xff] %v1731_v54 }
 0x38b   :  { %v2051_v28 = vpop.f32.mrb[28].mxu0 }
 0x38c   :  { %v1676_v18 = vadd.f32 %v2051_v28, %v3036_v40  ;;  %v1667_v5 = vpop.f32.mrb[29].mxu0 }
 0x38d   :  { %v1668_v15 = vadd.f32 %v3036_v40, %v1667_v5  ;;  %v2052_v63 = vpop.f32.mrb[30].mxu0 }
 0x38e   :  { %v1720_v10 = vadd.f32 %v1676_v18, %v1564_v29  ;;  %v1679_v47 = vadd.f32 %v2052_v63, %v3036_v40  ;;  %v1670_v0 = vpop.f32.mrb[31].mxu0 }
 0x38f   :  { %v1718_v35 = vadd.f32 %v1668_v15, %v1562_v51  ;;  %v1671_v36 = vadd.f32 %v3036_v40, %v1670_v0 }
 0x390   :  { %v1736_v2 = vmax.f32 %v1720_v10, 0.0  ;;  %v1721_v45 = vadd.f32 %v1679_v47, %v1565_v38 }
 0x391   :  { %v1734_v52 = vmax.f32 %v1718_v35, 0.0  ;;  %v1719_v60 = vadd.f32 %v1671_v36, %v1563_v53 }
 0x392   :  { %1752 = vst [vmem:[#allocation2 + $0x30] sm:$0xff] %v1736_v2  ;;  %v1737_v32 = vmax.f32 %v1721_v45, 0.0 }
 0x393   :  { %1750 = vst [vmem:[#allocation2 + $0x20] sm:$0xff] %v1734_v52  ;;  %v1735_v1 = vmax.f32 %v1719_v60, 0.0 }
 0x394   :  { %1753 = vst [vmem:[#allocation2 + $0x38] sm:$0xff] %v1737_v32 }
 0x395   :  { %1751 = vst [vmem:[#allocation2 + $0x28] sm:$0xff] %v1735_v1 }
 0x3e0   :  { %v2055_v55 = vpop.f32.mrb[32].mxu0 }
 0x3e1   :  { %v1692_v31 = vadd.f32 %v2055_v55, %v3036_v40  ;;  %v1683_v57 = vpop.f32.mrb[33].mxu0 }
 0x3e2   :  { %v1684_v6 = vadd.f32 %v3036_v40, %v1683_v57  ;;  %v2056_v9 = vpop.f32.mrb[34].mxu0 }
 0x3e3   :  { %v1724_v56 = vadd.f32 %v1692_v31, %v1568_v16  ;;  %v1695_v23 = vadd.f32 %v2056_v9, %v3036_v40  ;;  %v1686_v41 = vpop.f32.mrb[35].mxu0 }
 0x3e4   :  { %v1722_v21 = vadd.f32 %v1684_v6, %v1566_v37  ;;  %v1687_v13 = vadd.f32 %v3036_v40, %v1686_v41 }
 0x3e5   :  { %v1740_v59 = vmax.f32 %v1724_v56, 0.0  ;;  %v1725_v62 = vadd.f32 %v1695_v23, %v1569_v61 }
 0x3e6   :  { %v1738_v24 = vmax.f32 %v1722_v21, 0.0  ;;  %v1723_v39 = vadd.f32 %v1687_v13, %v1567_v25 }
 0x3e7   :  { %1756 = vst [vmem:[#allocation2 + $0x50] sm:$0xff] %v1740_v59  ;;  %v1741_v26 = vmax.f32 %v1725_v62, 0.0 }
 0x3e8   :  { %1754 = vst [vmem:[#allocation2 + $0x40] sm:$0xff] %v1738_v24  ;;  %v1739_v22 = vmax.f32 %v1723_v39, 0.0  ;;  %v2059_v3 = vpop.f32.mrb[36].mxu0 }
 0x3e9   :  { %1757 = vst [vmem:[#allocation2 + $0x58] sm:$0xff] %v1741_v26  ;;  %v1708_v17 = vadd.f32 %v2059_v3, %v3036_v40  ;;  %v1699_v19 = vpop.f32.mrb[37].mxu0 }
 0x3ea   :  { %1755 = vst [vmem:[#allocation2 + $0x48] sm:$0xff] %v1739_v22  ;;  %v1700_v7 = vadd.f32 %v3036_v40, %v1699_v19  ;;  %v2060_v43 = vpop.f32.mrb[38].mxu0 }
 0x3eb   :  { %v1728_v30 = vadd.f32 %v1708_v17, %v1572_v44  ;;  %v1711_v49 = vadd.f32 %v2060_v43, %v3036_v40  ;;  %v1702_v14 = vpop.f32.mrb[39].mxu0 }
 0x3ec   :  { %v1726_v48 = vadd.f32 %v1700_v7, %v1570_v58  ;;  %v1703_v33 = vadd.f32 %v3036_v40, %v1702_v14 }
 0x3ed   :  { %v1744_v12 = vmax.f32 %v1728_v30, 0.0  ;;  %v1729_v20 = vadd.f32 %v1711_v49, %v1573_v42 }
 0x3ee   :  { %v1742_v54 = vmax.f32 %v1726_v48, 0.0  ;;  %v1727_v8 = vadd.f32 %v1703_v33, %v1571_v27 }
 0x3ef   :  { %1760 = vst [vmem:[#allocation2 + $0x70] sm:$0xff] %v1744_v12  ;;  %v1745_v29 = vmax.f32 %v1729_v20, 0.0 }
 0x3f0   :  { %1758 = vst [vmem:[#allocation2 + $0x60] sm:$0xff] %v1742_v54  ;;  %v1743_v28 = vmax.f32 %v1727_v8, 0.0 }
 0x3f1   :  { %1761 = vst [vmem:[#allocation2 + $0x78] sm:$0xff] %v1745_v29 }
 0x3f2   :  { %1759 = vst [vmem:[#allocation2 + $0x68] sm:$0xff] %v1743_v28 }
 0x3f3   :  { %2140 = shalt.err (!%p2137_p4)
}
 0x3f4   :  { %s2141_s1 = scalar_lea.hbm %s3097_s7, 2048 }
 0x3f5   :  { %p2142_p5 = scmp.ne.s32.totalorder %s3097_s7, %s2141_s1  ;;  %p2145_p6 = scmp.lt.u32.totalorder %s2141_s1, %s3097_s7 }
 0x3f7   :  { %p2147_p7 = pnand %p2145_p6, %p2142_p5 }
 0x3f9   :  { %2150 = shalt.err (!%p2147_p7)
}
 0x3fa   :  { %s2158_s5 = smov 128   ;;  %s2159_s26 = smov 8  }
 0x3fb   :  { %1773 = dma.vmem_to_hbm [thread:$0]  %s1768_s22, 2048, %s3097_s7, [#allocation3], %s2158_s5, %s2158_s5, %s2159_s26  }
 0x3fc   :  { %2151 = dma.done.wait [#allocation3], 2048  }
 0x3fd   :  { %2152 = vsyncadd [#allocation3], 4294965248 }
 0x3fe   :  { %1777 = vsyncpa [#allocation3], 1 }

</bundles_post_ra>
